<compile_context>
chip_gen: v7x
topology: tpu7x:2x2x1
jax: 0.10.0
libtpu: 0.0.40
codegen_flags: <defaults>
</compile_context>

<pallas_src>
import functools

import jax
import jax.numpy as jnp
from jax.experimental import pallas as pl
from jax.experimental.pallas import tpu as pltpu


_NEG_BIG = -1e30  # fills padded class columns; exp() underflows to exactly 0 in f32


def _round_up(x, m):
    return ((x + m - 1) // m) * m


def _num_tensorcores():
    """Best-effort TensorCores-per-device (v7x/v5p/v4 megacore = 2, v5e/v6e = 1)."""
    try:
        info = pltpu.get_tpu_info()
        for attr in ("num_cores", "core_count", "num_tensorcores", "tensorcore_count"):
            v = getattr(info, attr, None)
            if isinstance(v, int) and v > 0:
                return v
    except Exception:
        pass
    try:
        kind = jax.devices()[0].device_kind.lower()
        if any(tag in kind for tag in ("v7", "v5p", "v4")):
            return 2
    except Exception:
        pass
    return 1  # safe default: single grid step when the batch fits


def _mxu_lane_granularity():
    """K/N padding granularity for large dims: 256 fills the 2x256^2 MXU on
    v6e/v7x; 128 is already optimal for the 4x128^2 MXU on v5e."""
    try:
        kind = jax.devices()[0].device_kind.lower()
        if any(tag in kind for tag in ("v6", "v7")):
            return 256
    except Exception:
        pass
    return 128


def _pad_feature_dim(d, gran):
    if d <= 128:
        return _round_up(d, 128)
    return _round_up(d, gran)


def _choose_tm(n_rows, tm_max, num_tc):
    """Batch tile: multiple of 16 (bf16 sublane packing).  Single grid step on
    single-TC chips whenever the batch fits; split across TCs only when each
    step is big enough (>=256 rows total) to amortize per-step overhead."""
    npad = _round_up(max(n_rows, 1), 16)
    if npad <= tm_max:
        if num_tc >= 2 and npad >= 256:
            return _round_up(pl.cdiv(npad, num_tc), 16)
        return npad
    return tm_max


# ---------------------------------------------------------------------------
# Fused kernel: ((x @ W_i + shift_i) -> relu)*  ->  x @ W_L + b_L -> log_softmax
# ---------------------------------------------------------------------------
def _make_fused_mlp_kernel(num_hidden, compute_dtype):
    def kernel(*refs):
        # refs = (x_ref, [w_i, shift_i]*num_hidden, w_last, b_last, o_ref)
        x_ref = refs[0]
        o_ref = refs[-1]

        h = x_ref[...].astype(compute_dtype)      # (tm, F) cast to bf16 in-kernel
        idx = 1
        for _ in range(num_hidden):
            w_ref, s_ref = refs[idx], refs[idx + 1]
            idx += 2
            y = jnp.dot(h, w_ref[...], preferred_element_type=jnp.float32)
            y = y + s_ref[...]                     # folded bias*scale + BN shift (f32)
            h = jnp.maximum(y, 0.0).astype(compute_dtype)
            # TODO(synk): F.dropout is identity in eval mode; training-mode dropout
            # would need pltpu.prng_seed / pltpu.prng_random_bits here.

        w_ref, b_ref = refs[idx], refs[idx + 1]
        z = jnp.dot(h, w_ref[...], preferred_element_type=jnp.float32)
        z = z + b_ref[...]                         # padded class cols carry -1e30
        m = jnp.max(z, axis=-1, keepdims=True)
        zc = z - m
        lse = jnp.log(jnp.sum(jnp.exp(zc), axis=-1, keepdims=True))
        o_ref[...] = (zc - lse).astype(o_ref.dtype)

    return kernel


# ---------------------------------------------------------------------------
# Parameters: raw (PyTorch-shaped) -> folded & lane-padded for the kernel
# ---------------------------------------------------------------------------
def init_raw_params(key, in_channels, hidden_channels, out_channels, num_layers):
    """Deterministic synthetic parameters; mirrors the PyTorch module shapes.
    Linear weights are stored already transposed: [in_features, out_features]."""
    dims = [in_channels] + [hidden_channels] * (num_layers - 1) + [out_channels]
    raw = {"lins": [], "bns": []}
    for li in range(num_layers):
        key, kw, kb = jax.random.split(key, 3)
        fan_in, fan_out = dims[li], dims[li + 1]
        bound = 1.0 / jnp.sqrt(jnp.float32(fan_in))
        w = jax.random.uniform(kw, (fan_in, fan_out), jnp.float32, -bound, bound)
        b = jax.random.uniform(kb, (fan_out,), jnp.float32, -bound, bound)
        raw["lins"].append((w, b))
    for _ in range(num_layers - 1):
        key, kg, kbe, km, kv = jax.random.split(key, 5)
        h = hidden_channels
        gamma = 1.0 + 0.1 * jax.random.normal(kg, (h,), jnp.float32)
        beta = 0.1 * jax.random.normal(kbe, (h,), jnp.float32)
        running_mean = 0.1 * jax.random.normal(km, (h,), jnp.float32)
        running_var = jnp.abs(1.0 + 0.1 * jax.random.normal(kv, (h,), jnp.float32))
        raw["bns"].append((gamma, beta, running_mean, running_var))
    return raw


def fold_and_pad_params(raw, compute_dtype=jnp.bfloat16, eps=1e-5):
    """Fold eval-mode BN + bias into the weights; pad hidden/class dims lane-dense.
    The INPUT feature dim stays unpadded (x is fed unpadded to the kernel)."""
    n_layers = len(raw["lins"])
    dims = [raw["lins"][0][0].shape[0]] + [w.shape[1] for (w, _) in raw["lins"]]
    gran = _mxu_lane_granularity()
    pdims = [dims[0]] + [_pad_feature_dim(d, gran) for d in dims[1:]]

    folded = {"hidden": [], "last": None}
    for i in range(n_layers - 1):
        w, b = raw["lins"][i]
        gamma, beta, mean, var = raw["bns"][i]
        scale = gamma / jnp.sqrt(var + eps)                  # (out,)
        w_f = w * scale[None, :]                             # fold BN scale into W
        shift = b * scale + (beta - mean * scale)            # fold bias + BN shift
        wp = jnp.zeros((pdims[i], pdims[i + 1]), jnp.float32)
        wp = wp.at[: dims[i], : dims[i + 1]].set(w_f)
        sp = jnp.zeros((1, pdims[i + 1]), jnp.float32)       # padded cols -> relu(0)=0
        sp = sp.at[0, : dims[i + 1]].set(shift)
        folded["hidden"].append((wp.astype(compute_dtype), sp))

    w, b = raw["lins"][-1]
    wp = jnp.zeros((pdims[-2], pdims[-1]), jnp.float32)
    wp = wp.at[: dims[-2], : dims[-1]].set(w)
    bp = jnp.full((1, pdims[-1]), _NEG_BIG, jnp.float32)     # mask padded classes
    bp = bp.at[0, : dims[-1]].set(b)
    folded["last"] = (wp.astype(compute_dtype), bp)
    return folded


# ---------------------------------------------------------------------------
# Forward pass: one fused pallas_call
# ---------------------------------------------------------------------------
@functools.partial(
    jax.jit,
    static_argnames=("tm_max", "num_tc", "single_buffer_weights", "out_dtype"))
def _mlp_forward_padded(folded, x, *, tm_max, num_tc, single_buffer_weights,
                        out_dtype):
    hidden = folded["hidden"]
    w_last, b_last = folded["last"]
    compute_dtype = w_last.dtype

    n, f = x.shape
    op = w_last.shape[1]
    tm = _choose_tm(n, tm_max, num_tc)
    grid = (pl.cdiv(n, tm),)

    kernel = _make_fused_mlp_kernel(len(hidden), compute_dtype)

    # Grid-invariant weights/shifts: constant index_map keeps them VMEM-resident;
    # request a single buffer (no point double-buffering data that never changes).
    def w_spec(arr):
        if single_buffer_weights:
            return pl.BlockSpec(arr.shape, lambda i: (0, 0),
                                pipeline_mode=pl.Buffered(1))
        return pl.BlockSpec(arr.shape, lambda i: (0, 0))

    # x is fed unpadded: block (tm, f) with f == full array dim (legal); the
    # ragged last row-block is handled by Pallas (reads of OOB rows are garbage,
    # OOB output rows are masked) — rows are fully independent.
    in_specs = [pl.BlockSpec((tm, f), lambda i: (i, 0))]
    args = [x]
    for (w, s) in hidden:
        in_specs += [w_spec(w), w_spec(s)]
        args += [w, s]
    in_specs += [w_spec(w_last), w_spec(b_last)]
    args += [w_last, b_last]

    # Explicit scoped-VMEM budget: resident weights (x buffer_count) +
    # double-buffered x / out tiles + headroom for live f32 intermediates.
    wbuf = 1 if single_buffer_weights else 2
    weight_bytes = sum(a.size * a.dtype.itemsize for pair in hidden for a in pair)
    weight_bytes += (w_last.size * w_last.dtype.itemsize
                     + b_last.size * b_last.dtype.itemsize)
    weight_bytes *= wbuf
    max_dim = max([f, op] + [w.shape[1] for (w, _) in hidden])
    tile_bytes = (2 * tm * f * x.dtype.itemsize
                  + 2 * tm * op * jnp.dtype(out_dtype).itemsize)
    headroom = 6 * tm * max_dim * 4
    vmem_limit = int(1.25 * (weight_bytes + tile_bytes + headroom))
    vmem_limit = min(max(vmem_limit, 32 * 1024 * 1024), 128 * 1024 * 1024)
    # TODO(synk): if weight_bytes approaches v7x's 64 MiB/TC VMEM, stream weights
    # per layer (extra "arbitrary" grid axis / pltpu.emit_pipeline) instead of
    # keeping the whole stack resident; not needed at these sizes.

    return pl.pallas_call(
        kernel,
        out_shape=jax.ShapeDtypeStruct((n, op), out_dtype),
        grid_spec=pltpu.PrefetchScalarGridSpec(
            num_scalar_prefetch=0,
            grid=grid,
            in_specs=in_specs,
            out_specs=pl.BlockSpec((tm, op), lambda i: (i, 0)),
        ),
        compiler_params=pltpu.CompilerParams(
            dimension_semantics=("parallel",),
            vmem_limit_bytes=vmem_limit,
        ),
    )(*args)


def mlp_forward(folded, x, *, out_channels, tm_max=256, out_dtype=jnp.float32):
    num_tc = _num_tensorcores()
    kwargs = dict(tm_max=tm_max, num_tc=num_tc, out_dtype=out_dtype)
    try:
        out = _mlp_forward_padded(folded, x, single_buffer_weights=True, **kwargs)
    except Exception:
        # Fallback if this JAX build rejects single-buffered (Buffered(1)) specs.
        out = _mlp_forward_padded(folded, x, single_buffer_weights=False, **kwargs)
    # Column slice only (rows are exact).  Callers able to consume the 128-lane
    # padded layout directly should skip this small copy.
    return out[:, :out_channels]


# ---------------------------------------------------------------------------
# Pure-JAX reference (same bf16 matmul casts, computed from RAW params)
# ---------------------------------------------------------------------------
def mlp_forward_ref(raw, x, compute_dtype=jnp.bfloat16, eps=1e-5):
    h = x
    n_layers = len(raw["lins"])
    for i in range(n_layers - 1):
        w, b = raw["lins"][i]
        gamma, beta, mean, var = raw["bns"][i]
        scale = gamma / jnp.sqrt(var + eps)
        wf = (w * scale[None, :]).astype(compute_dtype)
        shift = b * scale + (beta - mean * scale)
        y = jnp.dot(h.astype(compute_dtype), wf,
                    preferred_element_type=jnp.float32) + shift[None, :]
        h = jnp.maximum(y, 0.0)
    w, b = raw["lins"][-1]
    z = jnp.dot(h.astype(compute_dtype), w.astype(compute_dtype),
                preferred_element_type=jnp.float32) + b[None, :]
    return jax.nn.log_softmax(z, axis=-1)


if __name__ == "__main__":
    key = jax.random.PRNGKey(0)

    # Small shapes consistent with the module's forward (non-multiple batch
    # exercises the ragged row-block path).
    batch = 200
    in_channels = 16
    hidden_channels = 32
    out_channels = 8
    num_layers = 3

    kp, kx = jax.random.split(key)
    raw = init_raw_params(kp, in_channels, hidden_channels, out_channels,
                          num_layers)
    folded = fold_and_pad_params(raw, compute_dtype=jnp.bfloat16)
    x = jax.random.normal(kx, (batch, in_channels), jnp.float32)

    out = mlp_forward(folded, x, out_channels=out_channels, tm_max=256)
    out = jax.block_until_ready(out)

    ref = mlp_forward_ref(raw, x, compute_dtype=jnp.bfloat16)
    assert out.shape == (batch, out_channels)
    assert jnp.allclose(out, ref, atol=2e-3, rtol=2e-3), "mismatch vs reference"
    # rows of log_softmax should exp-sum to 1
    assert jnp.allclose(jnp.sum(jnp.exp(out), axis=-1), 1.0, atol=2e-3)

    print("KERNEL_OK")
</pallas_src>

<mosaic_0001>
module attributes {stable_mosaic.version = 11 : i64} {
  func.func @kernel(%arg0: i32, %arg1: memref<208x16xf32, #tpu.memory_space<vmem>>, %arg2: memref<16x128xbf16, #tpu.memory_space<vmem>>, %arg3: memref<1x128xf32, #tpu.memory_space<vmem>>, %arg4: memref<128x128xbf16, #tpu.memory_space<vmem>>, %arg5: memref<1x128xf32, #tpu.memory_space<vmem>>, %arg6: memref<128x128xbf16, #tpu.memory_space<vmem>>, %arg7: memref<1x128xf32, #tpu.memory_space<vmem>>, %arg8: memref<208x128xf32, #tpu.memory_space<vmem>>) attributes {dimension_semantics = [#tpu.dimension_semantics<parallel>], iteration_bounds = array<i64: 1>, scalar_prefetch = 0 : i64, scratch_operands = 0 : i64, tpu.core_type = #tpu.core_type<tc>, window_params = [{transform_indices = @transform_0, window_bounds = array<i64: 208, 16>}, {pipeline_mode = #tpu.pipeline_mode<synchronous>, transform_indices = @transform_1, window_bounds = array<i64: 16, 128>}, {pipeline_mode = #tpu.pipeline_mode<synchronous>, transform_indices = @transform_2, window_bounds = array<i64: 1, 128>}, {pipeline_mode = #tpu.pipeline_mode<synchronous>, transform_indices = @transform_3, window_bounds = array<i64: 128, 128>}, {pipeline_mode = #tpu.pipeline_mode<synchronous>, transform_indices = @transform_4, window_bounds = array<i64: 1, 128>}, {pipeline_mode = #tpu.pipeline_mode<synchronous>, transform_indices = @transform_5, window_bounds = array<i64: 128, 128>}, {pipeline_mode = #tpu.pipeline_mode<synchronous>, transform_indices = @transform_6, window_bounds = array<i64: 1, 128>}, {transform_indices = @transform_7, window_bounds = array<i64: 208, 128>}]} {
    %c0 = arith.constant 0 : index
    %c0_0 = arith.constant 0 : index
    %0 = vector.load %arg1[%c0, %c0_0] : memref<208x16xf32, #tpu.memory_space<vmem>>, vector<208x16xf32>
    %1 = arith.truncf %0 : vector<208x16xf32> to vector<208x16xbf16>
    %c0_1 = arith.constant 0 : index
    %c0_2 = arith.constant 0 : index
    %2 = vector.load %arg2[%c0_1, %c0_2] : memref<16x128xbf16, #tpu.memory_space<vmem>>, vector<16x128xbf16>
    %cst = arith.constant dense<0.000000e+00> : vector<208x128xf32>
    %3 = tpu.matmul %1, %2, %cst {dimension_numbers = #tpu.dot_dimension_numbers<[1], [0], [0], [1], [0, 0, 1, 1], [], []>} : vector<208x16xbf16>, vector<16x128xbf16>, vector<208x128xf32> -> vector<208x128xf32>
    %c0_3 = arith.constant 0 : index
    %c0_4 = arith.constant 0 : index
    %4 = vector.load %arg3[%c0_3, %c0_4] : memref<1x128xf32, #tpu.memory_space<vmem>>, vector<1x128xf32>
    %5 = vector.broadcast %4 : vector<1x128xf32> to vector<208x128xf32>
    %6 = arith.addf %3, %5 : vector<208x128xf32>
    %cst_5 = arith.constant 0.000000e+00 : f32
    %7 = vector.broadcast %cst_5 : f32 to vector<208x128xf32>
    %8 = arith.maximumf %6, %7 : vector<208x128xf32>
    %9 = arith.truncf %8 : vector<208x128xf32> to vector<208x128xbf16>
    %c0_6 = arith.constant 0 : index
    %c0_7 = arith.constant 0 : index
    %10 = vector.load %arg4[%c0_6, %c0_7] : memref<128x128xbf16, #tpu.memory_space<vmem>>, vector<128x128xbf16>
    %cst_8 = arith.constant dense<0.000000e+00> : vector<208x128xf32>
    %11 = tpu.matmul %9, %10, %cst_8 {dimension_numbers = #tpu.dot_dimension_numbers<[1], [0], [0], [1], [0, 0, 1, 1], [], []>} : vector<208x128xbf16>, vector<128x128xbf16>, vector<208x128xf32> -> vector<208x128xf32>
    %c0_9 = arith.constant 0 : index
    %c0_10 = arith.constant 0 : index
    %12 = vector.load %arg5[%c0_9, %c0_10] : memref<1x128xf32, #tpu.memory_space<vmem>>, vector<1x128xf32>
    %13 = vector.broadcast %12 : vector<1x128xf32> to vector<208x128xf32>
    %14 = arith.addf %11, %13 : vector<208x128xf32>
    %cst_11 = arith.constant 0.000000e+00 : f32
    %15 = vector.broadcast %cst_11 : f32 to vector<208x128xf32>
    %16 = arith.maximumf %14, %15 : vector<208x128xf32>
    %17 = arith.truncf %16 : vector<208x128xf32> to vector<208x128xbf16>
    %c0_12 = arith.constant 0 : index
    %c0_13 = arith.constant 0 : index
    %18 = vector.load %arg6[%c0_12, %c0_13] : memref<128x128xbf16, #tpu.memory_space<vmem>>, vector<128x128xbf16>
    %cst_14 = arith.constant dense<0.000000e+00> : vector<208x128xf32>
    %19 = tpu.matmul %17, %18, %cst_14 {dimension_numbers = #tpu.dot_dimension_numbers<[1], [0], [0], [1], [0, 0, 1, 1], [], []>} : vector<208x128xbf16>, vector<128x128xbf16>, vector<208x128xf32> -> vector<208x128xf32>
    %c0_15 = arith.constant 0 : index
    %c0_16 = arith.constant 0 : index
    %20 = vector.load %arg7[%c0_15, %c0_16] : memref<1x128xf32, #tpu.memory_space<vmem>>, vector<1x128xf32>
    %21 = vector.broadcast %20 : vector<1x128xf32> to vector<208x128xf32>
    %22 = arith.addf %19, %21 : vector<208x128xf32>
    %cst_17 = arith.constant dense<0xFF800000> : vector<208xf32>
    %23 = vector.multi_reduction <maximumf>, %22, %cst_17 [1] : vector<208x128xf32> to vector<208xf32>
    %24 = vector.shape_cast %23 : vector<208xf32> to vector<208x1xf32>
    %25 = vector.broadcast %24 : vector<208x1xf32> to vector<208x128xf32>
    %26 = arith.subf %22, %25 : vector<208x128xf32>
    %27 = math.exp %26 : vector<208x128xf32>
    %cst_18 = arith.constant dense<0.000000e+00> : vector<208xf32>
    %28 = vector.multi_reduction <add>, %27, %cst_18 [1] : vector<208x128xf32> to vector<208xf32>
    %29 = vector.shape_cast %28 : vector<208xf32> to vector<208x1xf32>
    %30 = math.log %29 : vector<208x1xf32>
    %31 = vector.broadcast %30 : vector<208x1xf32> to vector<208x128xf32>
    %32 = arith.subf %26, %31 : vector<208x128xf32>
    %c0_19 = arith.constant 0 : index
    %c0_20 = arith.constant 0 : index
    %33 = vector.load %arg8[%c0_19, %c0_20] : memref<208x128xf32, #tpu.memory_space<vmem>>, vector<208x128xf32>
    tpu.vector_store %arg8[%c0_19, %c0_20], %32 {strides = array<i32>} : memref<208x128xf32, #tpu.memory_space<vmem>>, vector<208x128xf32>,
    return
  }
  func.func @transform_0(%arg0: i32) -> (i32, i32) {
    %c0_i32 = arith.constant 0 : i32
    %c0_i32_0 = arith.constant 0 : i32
    return %arg0, %c0_i32 : i32, i32
  }
  func.func @transform_1(%arg0: i32) -> (i32, i32) {
    %c0_i32 = arith.constant 0 : i32
    %c0_i32_0 = arith.constant 0 : i32
    %c0_i32_1 = arith.constant 0 : i32
    return %c0_i32, %c0_i32_0 : i32, i32
  }
  func.func @transform_2(%arg0: i32) -> (i32, i32) {
    %c0_i32 = arith.constant 0 : i32
    %c0_i32_0 = arith.constant 0 : i32
    %c0_i32_1 = arith.constant 0 : i32
    return %c0_i32, %c0_i32_0 : i32, i32
  }
  func.func @transform_3(%arg0: i32) -> (i32, i32) {
    %c0_i32 = arith.constant 0 : i32
    %c0_i32_0 = arith.constant 0 : i32
    %c0_i32_1 = arith.constant 0 : i32
    return %c0_i32, %c0_i32_0 : i32, i32
  }
  func.func @transform_4(%arg0: i32) -> (i32, i32) {
    %c0_i32 = arith.constant 0 : i32
    %c0_i32_0 = arith.constant 0 : i32
    %c0_i32_1 = arith.constant 0 : i32
    return %c0_i32, %c0_i32_0 : i32, i32
  }
  func.func @transform_5(%arg0: i32) -> (i32, i32) {
    %c0_i32 = arith.constant 0 : i32
    %c0_i32_0 = arith.constant 0 : i32
    %c0_i32_1 = arith.constant 0 : i32
    return %c0_i32, %c0_i32_0 : i32, i32
  }
  func.func @transform_6(%arg0: i32) -> (i32, i32) {
    %c0_i32 = arith.constant 0 : i32
    %c0_i32_0 = arith.constant 0 : i32
    %c0_i32_1 = arith.constant 0 : i32
    return %c0_i32, %c0_i32_0 : i32, i32
  }
  func.func @transform_7(%arg0: i32) -> (i32, i32) {
    %c0_i32 = arith.constant 0 : i32
    %c0_i32_0 = arith.constant 0 : i32
    return %arg0, %c0_i32 : i32, i32
  }
}

module attributes {stable_mosaic.version = 11 : i64} {
  func.func @kernel(%arg0: i32, %arg1: memref<208x16xf32, #tpu.memory_space<vmem>>, %arg2: memref<16x128xbf16, #tpu.memory_space<vmem>>, %arg3: memref<1x128xf32, #tpu.memory_space<vmem>>, %arg4: memref<128x128xbf16, #tpu.memory_space<vmem>>, %arg5: memref<1x128xf32, #tpu.memory_space<vmem>>, %arg6: memref<128x128xbf16, #tpu.memory_space<vmem>>, %arg7: memref<1x128xf32, #tpu.memory_space<vmem>>, %arg8: memref<208x128xf32, #tpu.memory_space<vmem>>) attributes {dimension_semantics = [#tpu.dimension_semantics<parallel>], iteration_bounds = array<i64: 1>, scalar_prefetch = 0 : i64, scratch_operands = 0 : i64, tpu.core_type = #tpu.core_type<tc>, window_params = [{transform_indices = @transform_0, window_bounds = array<i64: 208, 16>}, {pipeline_mode = #tpu.pipeline_mode<synchronous>, transform_indices = @transform_1, window_bounds = array<i64: 16, 128>}, {pipeline_mode = #tpu.pipeline_mode<synchronous>, transform_indices = @transform_2, window_bounds = array<i64: 1, 128>}, {pipeline_mode = #tpu.pipeline_mode<synchronous>, transform_indices = @transform_3, window_bounds = array<i64: 128, 128>}, {pipeline_mode = #tpu.pipeline_mode<synchronous>, transform_indices = @transform_4, window_bounds = array<i64: 1, 128>}, {pipeline_mode = #tpu.pipeline_mode<synchronous>, transform_indices = @transform_5, window_bounds = array<i64: 128, 128>}, {pipeline_mode = #tpu.pipeline_mode<synchronous>, transform_indices = @transform_6, window_bounds = array<i64: 1, 128>}, {transform_indices = @transform_7, window_bounds = array<i64: 208, 128>}]} {
    %c0 = arith.constant 0 : index
    %c0_0 = arith.constant 0 : index
    %0 = vector.load %arg1[%c0, %c0_0] : memref<208x16xf32, #tpu.memory_space<vmem>>, vector<208x16xf32>
    %1 = arith.truncf %0 : vector<208x16xf32> to vector<208x16xbf16>
    %c0_1 = arith.constant 0 : index
    %c0_2 = arith.constant 0 : index
    %2 = vector.load %arg2[%c0_1, %c0_2] : memref<16x128xbf16, #tpu.memory_space<vmem>>, vector<16x128xbf16>
    %cst = arith.constant dense<0.000000e+00> : vector<208x128xf32>
    %3 = tpu.matmul %1, %2, %cst {dimension_numbers = #tpu.dot_dimension_numbers<[1], [0], [0], [1], [0, 0, 1, 1], [], []>} : vector<208x16xbf16>, vector<16x128xbf16>, vector<208x128xf32> -> vector<208x128xf32>
    %c0_3 = arith.constant 0 : index
    %c0_4 = arith.constant 0 : index
    %4 = vector.load %arg3[%c0_3, %c0_4] : memref<1x128xf32, #tpu.memory_space<vmem>>, vector<1x128xf32>
    %5 = vector.broadcast %4 : vector<1x128xf32> to vector<208x128xf32>
    %6 = arith.addf %3, %5 : vector<208x128xf32>
    %cst_5 = arith.constant 0.000000e+00 : f32
    %7 = vector.broadcast %cst_5 : f32 to vector<208x128xf32>
    %8 = arith.maximumf %6, %7 : vector<208x128xf32>
    %9 = arith.truncf %8 : vector<208x128xf32> to vector<208x128xbf16>
    %c0_6 = arith.constant 0 : index
    %c0_7 = arith.constant 0 : index
    %10 = vector.load %arg4[%c0_6, %c0_7] : memref<128x128xbf16, #tpu.memory_space<vmem>>, vector<128x128xbf16>
    %cst_8 = arith.constant dense<0.000000e+00> : vector<208x128xf32>
    %11 = tpu.matmul %9, %10, %cst_8 {dimension_numbers = #tpu.dot_dimension_numbers<[1], [0], [0], [1], [0, 0, 1, 1], [], []>} : vector<208x128xbf16>, vector<128x128xbf16>, vector<208x128xf32> -> vector<208x128xf32>
    %c0_9 = arith.constant 0 : index
    %c0_10 = arith.constant 0 : index
    %12 = vector.load %arg5[%c0_9, %c0_10] : memref<1x128xf32, #tpu.memory_space<vmem>>, vector<1x128xf32>
    %13 = vector.broadcast %12 : vector<1x128xf32> to vector<208x128xf32>
    %14 = arith.addf %11, %13 : vector<208x128xf32>
    %cst_11 = arith.constant 0.000000e+00 : f32
    %15 = vector.broadcast %cst_11 : f32 to vector<208x128xf32>
    %16 = arith.maximumf %14, %15 : vector<208x128xf32>
    %17 = arith.truncf %16 : vector<208x128xf32> to vector<208x128xbf16>
    %c0_12 = arith.constant 0 : index
    %c0_13 = arith.constant 0 : index
    %18 = vector.load %arg6[%c0_12, %c0_13] : memref<128x128xbf16, #tpu.memory_space<vmem>>, vector<128x128xbf16>
    %cst_14 = arith.constant dense<0.000000e+00> : vector<208x128xf32>
    %19 = tpu.matmul %17, %18, %cst_14 {dimension_numbers = #tpu.dot_dimension_numbers<[1], [0], [0], [1], [0, 0, 1, 1], [], []>} : vector<208x128xbf16>, vector<128x128xbf16>, vector<208x128xf32> -> vector<208x128xf32>
    %c0_15 = arith.constant 0 : index
    %c0_16 = arith.constant 0 : index
    %20 = vector.load %arg7[%c0_15, %c0_16] : memref<1x128xf32, #tpu.memory_space<vmem>>, vector<1x128xf32>
    %21 = vector.broadcast %20 : vector<1x128xf32> to vector<208x128xf32>
    %22 = arith.addf %19, %21 : vector<208x128xf32>
    %cst_17 = arith.constant dense<0xFF800000> : vector<208xf32>
    %23 = vector.multi_reduction <maximumf>, %22, %cst_17 [1] : vector<208x128xf32> to vector<208xf32>
    %24 = vector.shape_cast %23 : vector<208xf32> to vector<208x1xf32>
    %25 = vector.broadcast %24 : vector<208x1xf32> to vector<208x128xf32>
    %26 = arith.subf %22, %25 : vector<208x128xf32>
    %27 = math.exp %26 : vector<208x128xf32>
    %cst_18 = arith.constant dense<0.000000e+00> : vector<208xf32>
    %28 = vector.multi_reduction <add>, %27, %cst_18 [1] : vector<208x128xf32> to vector<208xf32>
    %29 = vector.shape_cast %28 : vector<208xf32> to vector<208x1xf32>
    %30 = math.log %29 : vector<208x1xf32>
    %31 = vector.broadcast %30 : vector<208x1xf32> to vector<208x128xf32>
    %32 = arith.subf %26, %31 : vector<208x128xf32>
    %c0_19 = arith.constant 0 : index
    %c0_20 = arith.constant 0 : index
    %33 = vector.load %arg8[%c0_19, %c0_20] : memref<208x128xf32, #tpu.memory_space<vmem>>, vector<208x128xf32>
    tpu.vector_store %arg8[%c0_19, %c0_20], %32 {strides = array<i32>} : memref<208x128xf32, #tpu.memory_space<vmem>>, vector<208x128xf32>,
    return
  }
  func.func @transform_0(%arg0: i32) -> (i32, i32) {
    %c0_i32 = arith.constant 0 : i32
    %c0_i32_0 = arith.constant 0 : i32
    return %arg0, %c0_i32 : i32, i32
  }
  func.func @transform_1(%arg0: i32) -> (i32, i32) {
    %c0_i32 = arith.constant 0 : i32
    %c0_i32_0 = arith.constant 0 : i32
    %c0_i32_1 = arith.constant 0 : i32
    return %c0_i32, %c0_i32_0 : i32, i32
  }
  func.func @transform_2(%arg0: i32) -> (i32, i32) {
    %c0_i32 = arith.constant 0 : i32
    %c0_i32_0 = arith.constant 0 : i32
    %c0_i32_1 = arith.constant 0 : i32
    return %c0_i32, %c0_i32_0 : i32, i32
  }
  func.func @transform_3(%arg0: i32) -> (i32, i32) {
    %c0_i32 = arith.constant 0 : i32
    %c0_i32_0 = arith.constant 0 : i32
    %c0_i32_1 = arith.constant 0 : i32
    return %c0_i32, %c0_i32_0 : i32, i32
  }
  func.func @transform_4(%arg0: i32) -> (i32, i32) {
    %c0_i32 = arith.constant 0 : i32
    %c0_i32_0 = arith.constant 0 : i32
    %c0_i32_1 = arith.constant 0 : i32
    return %c0_i32, %c0_i32_0 : i32, i32
  }
  func.func @transform_5(%arg0: i32) -> (i32, i32) {
    %c0_i32 = arith.constant 0 : i32
    %c0_i32_0 = arith.constant 0 : i32
    %c0_i32_1 = arith.constant 0 : i32
    return %c0_i32, %c0_i32_0 : i32, i32
  }
  func.func @transform_6(%arg0: i32) -> (i32, i32) {
    %c0_i32 = arith.constant 0 : i32
    %c0_i32_0 = arith.constant 0 : i32
    %c0_i32_1 = arith.constant 0 : i32
    return %c0_i32, %c0_i32_0 : i32, i32
  }
  func.func @transform_7(%arg0: i32) -> (i32, i32) {
    %c0_i32 = arith.constant 0 : i32
    %c0_i32_0 = arith.constant 0 : i32
    return %arg0, %c0_i32 : i32, i32
  }
}

</mosaic_0001>

<bundles_post_ra>
// kernel: _mlp_forward_padded.1
= control target key start
LH: loop header
LB: loop body
LE: loop exit
PB: predicated region body
PF: predicated region fallthrough
CT: control target
= control target key end

     0   :  { %12 = vsyncpa [#allocation3], 0  ;;  %v1486_v1 = vmov 0.0   ;;  %vm1487_vm0 = vmmov 0   ;;  %vm82_vm1 = vcmask 130048   ;;  %s2091_s0 = inlined_call_operand.vmem [shape: f32[200,16], index: 0, kind: input, shape index: {}]   ;;  %s2092_s1 = inlined_call_operand.vmem [shape: bf16[16,128], index: 1, kind: input, shape index: {}]   ;;  %s2093_s2 = inlined_call_operand.vmem [shape: f32[1,128], index: 2, kind: input, shape index: {}]   ;;  %s2094_s3 = inlined_call_operand.vmem [shape: bf16[128,128], index: 3, kind: input, shape index: {}]   ;;  %s2095_s4 = inlined_call_operand.vmem [shape: f32[1,128], index: 4, kind: input, shape index: {}]   ;;  %s2096_s5 = inlined_call_operand.vmem [shape: bf16[128,128], index: 5, kind: input, shape index: {}]   ;;  %s2097_s6 = inlined_call_operand.vmem [shape: f32[1,128], index: 6, kind: input, shape index: {}]   ;;  %s2098_s7 = inlined_call_operand.hbm [shape: f32[200,128], index: 7, kind: output, shape index: {}]  }
   0x1   :  { %v1341_v0 = vld [vmem:[%s2092_s1] sm:$0xff]   ;;  %1144 = vmatprep.subr.bf16.mxu0 %v1486_v1  ;;  %v29_v3 = vld [vmem:[%s2091_s0 + $0x8] sm:$0xff]  ;;  %1334 = vmatprep.subr.bf16.mxu1 %v1486_v1  ;;  %v30_v5 = vld [vmem:[%s2091_s0 + $0x10] sm:$0xff] }
   0x2   :  { %v28_v2 = vld [vmem:[%s2091_s0] sm:$0xff]  ;;  %1145 = vmatpush3.bf16.msra.mxu0 %v1341_v0  ;;  %1146 = vmatprep.mubr.msk.bf16.mxu0 %vm1487_vm0, %v1486_v1  ;;  %v31_v6 = vld [vmem:[%s2091_s0 + $0x18] sm:$0xff]  ;;  %v42_v7 = vld [vmem:[%s2091_s0 + $0x70] sm:$0xff] }
   0x3   :  { %v54_v4 = vpack.c.bf16 %v29_v3, %v28_v2  ;;  %1335 = vmatpush3.bf16.msra.mxu1 %v1341_v0  ;;  %1174 = vmatprep.mubr.msk.bf16.mxu1 %vm1487_vm0, %v1486_v1  ;;  %v43_v8 = vld [vmem:[%s2091_s0 + $0x78] sm:$0xff]  ;;  %v55_v10 = vpack.c.bf16 %v31_v6, %v30_v5  ;;  %v44_v11 = vld [vmem:[%s2091_s0 + $0x80] sm:$0xff]  ;;  %v45_v12 = vld [vmem:[%s2091_s0 + $0x88] sm:$0xff] }
   0x4   :  { %1198 = vmatprep.subr.bf16.mxu1 %v1486_v1  ;;  %1266 = vmatprep.subr.bf16.mxu0 %v1486_v1  ;;  %v61_v9 = vpack.c.bf16 %v43_v8, %v42_v7  ;;  %v1342_v13 = vld [vmem:[%s2094_s3] sm:$0xff]   ;;  %v1343_v14 = vld [vmem:[%s2094_s3 + $0x8] sm:$0xff]   ;;  %v62_v16 = vpack.c.bf16 %v45_v12, %v44_v11  ;;  %v46_v18 = vld [vmem:[%s2091_s0 + $0x90] sm:$0xff] }
   0x5   :  { %1147 = vmatmul.mubr.msk.bf16.vlgmr.msra.gmra.mrb[0].mxu0 %vm82_vm1, %v54_v4  ;;  %v32_v15 = vld [vmem:[%s2091_s0 + $0x20] sm:$0xff]  ;;  %v33_v17 = vld [vmem:[%s2091_s0 + $0x28] sm:$0xff]  ;;  %v1344_v19 = vld [vmem:[%s2094_s3 + $0x10] sm:$0xff]  }
   0x6   :  { %1150 = vmatprep.mubr.msk.bf16.mxu0 %vm1487_vm0, %v1486_v1  ;;  %1175 = vmatmul.mubr.msk.bf16.vlgmr.msra.gmra.mrb[0].mxu1 %vm82_vm1, %v61_v9  ;;  %v56_v20 = vpack.c.bf16 %v33_v17, %v32_v15  ;;  %v47_v21 = vld [vmem:[%s2091_s0 + $0x98] sm:$0xff]  ;;  %v34_v23 = vld [vmem:[%s2091_s0 + $0x30] sm:$0xff]  ;;  %v1346_v26 = vld [vmem:[%s2094_s3 + $0x20] sm:$0xff]  }
   0x7   :  { %1178 = vmatprep.mubr.msk.bf16.mxu1 %vm1487_vm0, %v1486_v1  ;;  %1199 = vmatpush3.bf16.msra.mxu1 %v1342_v13  ;;  %v1345_v22 = vld [vmem:[%s2094_s3 + $0x18] sm:$0xff]   ;;  %v63_v25 = vpack.c.bf16 %v47_v21, %v46_v18  ;;  %v48_v28 = vld [vmem:[%s2091_s0 + $0xa0] sm:$0xff]  ;;  %v49_v29 = vld [vmem:[%s2091_s0 + $0xa8] sm:$0xff] }
   0x8   :  { %1200 = vmatprep.subr.bf16.mxu1 %v1486_v1  ;;  %v35_v24 = vld [vmem:[%s2091_s0 + $0x38] sm:$0xff]  ;;  %v1347_v30 = vld [vmem:[%s2094_s3 + $0x28] sm:$0xff]   ;;  %v64_v31 = vpack.c.bf16 %v49_v29, %v48_v28  ;;  %v36_v32 = vld [vmem:[%s2091_s0 + $0x40] sm:$0xff] }
   0x9   :  { %v57_v27 = vpack.c.bf16 %v35_v24, %v34_v23  ;;  %v37_v33 = vld [vmem:[%s2091_s0 + $0x48] sm:$0xff]  ;;  %v1348_v34 = vld [vmem:[%s2094_s3 + $0x30] sm:$0xff]   ;;  %v51_v37 = vld [vmem:[%s2091_s0 + $0xb8] sm:$0xff] }
   0xa   :  { %v58_v35 = vpack.c.bf16 %v37_v33, %v36_v32  ;;  %v50_v36 = vld [vmem:[%s2091_s0 + $0xb0] sm:$0xff]  ;;  %v39_v40 = vld [vmem:[%s2091_s0 + $0x58] sm:$0xff]  ;;  %v52_v42 = vld [vmem:[%s2091_s0 + $0xc0] sm:$0xff] }
   0xb   :  { %1201 = vmatpush3.bf16.msra.mxu1 %v1343_v14  ;;  %v65_v38 = vpack.c.bf16 %v51_v37, %v50_v36  ;;  %v38_v39 = vld [vmem:[%s2091_s0 + $0x50] sm:$0xff]  ;;  %v53_v43 = vld [vmem:[%s2091_s0 + $0xc8] sm:$0xff]  ;;  %v40_v45 = vld [vmem:[%s2091_s0 + $0x60] sm:$0xff] }
   0xc   :  { %1202 = vmatprep.subr.bf16.mxu1 %v1486_v1  ;;  %v59_v41 = vpack.c.bf16 %v39_v40, %v38_v39  ;;  %v66_v44 = vpack.c.bf16 %v53_v43, %v52_v42  ;;  %v41_v46 = vld [vmem:[%s2091_s0 + $0x68] sm:$0xff]  ;;  %v1349_v48 = vld [vmem:[%s2094_s3 + $0x38] sm:$0xff]   ;;  %v1350_v49 = vld [vmem:[%s2096_s5] sm:$0xff]  }
   0xd   :  { %1151 = vmatmul.mubr.msk.bf16.gmra.mrb[4].mxu0 %vm82_vm1, %v55_v10  ;;  %v60_v47 = vpack.c.bf16 %v41_v46, %v40_v45  ;;  %v1351_v50 = vld [vmem:[%s2096_s5 + $0x8] sm:$0xff]   ;;  %v1352_v51 = vld [vmem:[%s2096_s5 + $0x10] sm:$0xff]   ;;  %v1353_v52 = vld [vmem:[%s2096_s5 + $0x18] sm:$0xff]  }
   0xe   :  { %1154 = vmatprep.mubr.msk.bf16.mxu0 %vm1487_vm0, %v1486_v1  ;;  %1179 = vmatmul.mubr.msk.bf16.gmra.mrb[4].mxu1 %vm82_vm1, %v62_v16  ;;  %v1354_v53 = vld [vmem:[%s2096_s5 + $0x20] sm:$0xff]   ;;  %v1355_v54 = vld [vmem:[%s2096_s5 + $0x28] sm:$0xff]   ;;  %v1356_v56 = vld [vmem:[%s2096_s5 + $0x30] sm:$0xff]  }
   0xf   :  { %1182 = vmatprep.mubr.msk.bf16.mxu1 %vm1487_vm0, %v1486_v1  ;;  %1203 = vmatpush3.bf16.msra.mxu1 %v1344_v19  ;;  %v1716_v55 = vld [vmem:[%s2093_s2] ss:$0 sm:$0xff] }
  0x10   :  { %1204 = vmatprep.subr.bf16.mxu1 %v1486_v1  ;;  %1267 = vmatpush3.bf16.msra.mxu0 %v1350_v49 }
  0x11   :  { %1268 = vmatprep.subr.bf16.mxu0 %v1486_v1 }
  0x13   :  { %1205 = vmatpush3.bf16.msra.mxu1 %v1345_v22 }
  0x14   :  { %1206 = vmatprep.subr.bf16.mxu1 %v1486_v1  ;;  %1269 = vmatpush3.bf16.msra.mxu0 %v1351_v50 }
  0x15   :  { %1155 = vmatmul.mubr.msk.bf16.gmra.mrb[8].mxu0 %vm82_vm1, %v56_v20  ;;  %1270 = vmatprep.subr.bf16.mxu0 %v1486_v1 }
  0x16   :  { %1158 = vmatprep.mubr.msk.bf16.mxu0 %vm1487_vm0, %v1486_v1  ;;  %1183 = vmatmul.mubr.msk.bf16.gmra.mrb[8].mxu1 %vm82_vm1, %v63_v25 }
  0x17   :  { %1186 = vmatprep.mubr.msk.bf16.mxu1 %vm1487_vm0, %v1486_v1  ;;  %1207 = vmatpush3.bf16.msra.mxu1 %v1346_v26 }
  0x18   :  { %1208 = vmatprep.subr.bf16.mxu1 %v1486_v1  ;;  %1271 = vmatpush3.bf16.msra.mxu0 %v1352_v51 }
  0x19   :  { %1272 = vmatprep.subr.bf16.mxu0 %v1486_v1 }
  0x1b   :  { %1209 = vmatpush3.bf16.msra.mxu1 %v1347_v30 }
  0x1c   :  { %1210 = vmatprep.subr.bf16.mxu1 %v1486_v1  ;;  %1273 = vmatpush3.bf16.msra.mxu0 %v1353_v52 }
  0x1d   :  { %1159 = vmatmul.mubr.msk.bf16.gmra.mrb[12].mxu0 %vm82_vm1, %v57_v27  ;;  %1274 = vmatprep.subr.bf16.mxu0 %v1486_v1 }
  0x1e   :  { %1162 = vmatprep.mubr.msk.bf16.mxu0 %vm1487_vm0, %v1486_v1  ;;  %1187 = vmatmul.mubr.msk.bf16.gmra.mrb[12].mxu1 %vm82_vm1, %v64_v31 }
  0x1f   :  { %1190 = vmatprep.mubr.msk.bf16.mxu1 %vm1487_vm0, %v1486_v1  ;;  %1211 = vmatpush3.bf16.msra.mxu1 %v1348_v34 }
  0x20   :  { %1212 = vmatprep.subr.bf16.mxu1 %v1486_v1  ;;  %1275 = vmatpush3.bf16.msra.mxu0 %v1354_v53 }
  0x21   :  { %1276 = vmatprep.subr.bf16.mxu0 %v1486_v1 }
  0x23   :  { %1213 = vmatpush3.bf16.msra.mxu1 %v1349_v48 }
  0x24   :  { %1277 = vmatpush3.bf16.msra.mxu0 %v1355_v54 }
  0x25   :  { %1163 = vmatmul.mubr.msk.bf16.gmra.mrb[16].mxu0 %vm82_vm1, %v58_v35  ;;  %1278 = vmatprep.subr.bf16.mxu0 %v1486_v1 }
  0x26   :  { %1166 = vmatprep.mubr.msk.bf16.mxu0 %vm1487_vm0, %v1486_v1  ;;  %1191 = vmatmul.mubr.msk.bf16.gmra.mrb[16].mxu1 %vm82_vm1, %v65_v38 }
  0x27   :  { %1194 = vmatprep.mubr.msk.bf16.mxu1 %vm1487_vm0, %v1486_v1 }
  0x28   :  { %1279 = vmatpush3.bf16.msra.mxu0 %v1356_v56 }
  0x29   :  { %1280 = vmatprep.subr.bf16.mxu0 %v1486_v1 }
  0x2d   :  { %1167 = vmatmul.mubr.msk.bf16.gmra.mrb[20].mxu0 %vm82_vm1, %v59_v41 }
  0x2e   :  { %1170 = vmatprep.mubr.msk.bf16.mxu0 %vm1487_vm0, %v1486_v1  ;;  %1195 = vmatmul.mubr.msk.bf16.gmra.mrb[20].mxu1 %vm82_vm1, %v66_v44 }
  0x2f   :  { %1214 = vmatprep.mubr.msk.bf16.mxu1 %vm1487_vm0, %v1486_v1 }
  0x35   :  { %1171 = vmatmul.mubr.msk.bf16.gmra.mrb[24].mxu0 %vm82_vm1, %v60_v47 }
  0x36   :  { %1282 = vmatprep.mubr.msk.bf16.mxu0 %vm1487_vm0, %v1486_v1 }
  0xd8   :  { %v156_v57 = vpop.f32.mrb[0].mxu0 }
  0xd9   :  { %v157_v58 = vadd.f32 %v1716_v55, %v156_v57  ;;  %v1148_v59 = vpop.f32.mrb[1].mxu0  ;;  %v212_v63 = vpop.f32.mrb[0].mxu1 }
  0xda   :  { %v159_v60 = vpop.f32.mrb[2].mxu0  ;;  %v213_v3 = vadd.f32 %v1716_v55, %v212_v63  ;;  %v1176_v4 = vpop.f32.mrb[1].mxu1 }
  0xdb   :  { %v160_v61 = vadd.f32 %v1716_v55, %v159_v60  ;;  %v1149_v62 = vpop.f32.mrb[3].mxu0  ;;  %v259_v0 = vmax.f32 %v157_v58, 0.0  ;;  %v215_v5 = vpop.f32.mrb[2].mxu1 }
  0xdc   :  { %v273_v7 = vmax.f32 %v213_v3, 0.0  ;;  %v216_v8 = vadd.f32 %v1716_v55, %v215_v5  ;;  %v1177_v9 = vpop.f32.mrb[3].mxu1 }
  0xdd   :  { %v260_v2 = vmax.f32 %v160_v61, 0.0 }
  0xde   :  { %v274_v13 = vmax.f32 %v216_v8, 0.0 }
  0xdf   :  { %v285_v6 = vpack.c.bf16 %v260_v2, %v259_v0 }
  0xe0   :  { %v164_v10 = vpop.f32.mrb[4].mxu0  ;;  %v1731_v17 = vpack.c.bf16 %v274_v13, %v273_v7 }
  0xe1   :  { %v165_v11 = vadd.f32 %v1716_v55, %v164_v10  ;;  %v1152_v12 = vpop.f32.mrb[5].mxu0  ;;  %1215 = vmatmul.mubr.bf16.vlgmr.msra.gmra.mrb[24].mxu1 %v285_v6  ;;  %v220_v18 = vpop.f32.mrb[4].mxu1 }
  0xe2   :  { %v167_v14 = vpop.f32.mrb[6].mxu0  ;;  %1218 = vmatprep.mubr.msk.bf16.mxu1 %vm1487_vm0, %v1486_v1  ;;  %v221_v21 = vadd.f32 %v1716_v55, %v220_v18  ;;  %v1180_v22 = vpop.f32.mrb[5].mxu1 }
  0xe3   :  { %v168_v15 = vadd.f32 %v1716_v55, %v167_v14  ;;  %v1153_v16 = vpop.f32.mrb[7].mxu0  ;;  %v261_v19 = vmax.f32 %v165_v11, 0.0  ;;  %v223_v23 = vpop.f32.mrb[6].mxu1 }
  0xe4   :  { %v275_v25 = vmax.f32 %v221_v21, 0.0  ;;  %v224_v26 = vadd.f32 %v1716_v55, %v223_v23  ;;  %v1181_v27 = vpop.f32.mrb[7].mxu1 }
  0xe5   :  { %v262_v20 = vmax.f32 %v168_v15, 0.0 }
  0xe6   :  { %v276_v31 = vmax.f32 %v224_v26, 0.0 }
  0xe7   :  { %v286_v24 = vpack.c.bf16 %v262_v20, %v261_v19 }
  0xe8   :  { %v172_v28 = vpop.f32.mrb[8].mxu0  ;;  %v1739_v35 = vpack.c.bf16 %v276_v31, %v275_v25 }
  0xe9   :  { %v173_v29 = vadd.f32 %v1716_v55, %v172_v28  ;;  %v1156_v30 = vpop.f32.mrb[9].mxu0  ;;  %1219 = vmatmul.mubr.bf16.gmra.mrb[28].mxu1 %v286_v24  ;;  %v228_v36 = vpop.f32.mrb[8].mxu1 }
  0xea   :  { %v175_v32 = vpop.f32.mrb[10].mxu0  ;;  %1222 = vmatprep.mubr.msk.bf16.mxu1 %vm1487_vm0, %v1486_v1  ;;  %v229_v39 = vadd.f32 %v1716_v55, %v228_v36  ;;  %v1184_v40 = vpop.f32.mrb[9].mxu1 }
  0xeb   :  { %v176_v33 = vadd.f32 %v1716_v55, %v175_v32  ;;  %v1157_v34 = vpop.f32.mrb[11].mxu0  ;;  %v263_v37 = vmax.f32 %v173_v29, 0.0  ;;  %v231_v41 = vpop.f32.mrb[10].mxu1 }
  0xec   :  { %v277_v43 = vmax.f32 %v229_v39, 0.0  ;;  %v232_v44 = vadd.f32 %v1716_v55, %v231_v41  ;;  %v1185_v45 = vpop.f32.mrb[11].mxu1 }
  0xed   :  { %v264_v38 = vmax.f32 %v176_v33, 0.0 }
  0xee   :  { %v278_v49 = vmax.f32 %v232_v44, 0.0 }
  0xef   :  { %v287_v42 = vpack.c.bf16 %v264_v38, %v263_v37 }
  0xf0   :  { %v180_v46 = vpop.f32.mrb[12].mxu0  ;;  %v1747_v53 = vpack.c.bf16 %v278_v49, %v277_v43 }
  0xf1   :  { %v181_v47 = vadd.f32 %v1716_v55, %v180_v46  ;;  %v1160_v48 = vpop.f32.mrb[13].mxu0  ;;  %1223 = vmatmul.mubr.bf16.gmra.mrb[32].mxu1 %v287_v42  ;;  %v236_v54 = vpop.f32.mrb[12].mxu1 }
  0xf2   :  { %v183_v50 = vpop.f32.mrb[14].mxu0  ;;  %1226 = vmatprep.mubr.msk.bf16.mxu1 %vm1487_vm0, %v1486_v1  ;;  %v237_v58 = vadd.f32 %v1716_v55, %v236_v54  ;;  %v1188_v59 = vpop.f32.mrb[13].mxu1 }
  0xf3   :  { %v184_v51 = vadd.f32 %v1716_v55, %v183_v50  ;;  %v1161_v52 = vpop.f32.mrb[15].mxu0  ;;  %v265_v56 = vmax.f32 %v181_v47, 0.0  ;;  %v239_v60 = vpop.f32.mrb[14].mxu1 }
  0xf4   :  { %v279_v62 = vmax.f32 %v237_v58, 0.0  ;;  %v240_v63 = vadd.f32 %v1716_v55, %v239_v60  ;;  %v1189_v0 = vpop.f32.mrb[15].mxu1 }
  0xf5   :  { %v266_v57 = vmax.f32 %v184_v51, 0.0 }
  0xf6   :  { %v280_v5 = vmax.f32 %v240_v63, 0.0 }
  0xf7   :  { %v288_v61 = vpack.c.bf16 %v266_v57, %v265_v56 }
  0xf8   :  { %v188_v2 = vpop.f32.mrb[16].mxu0  ;;  %v295_v9 = vpack.c.bf16 %v280_v5, %v279_v62 }
  0xf9   :  { %v189_v3 = vadd.f32 %v1716_v55, %v188_v2  ;;  %v1164_v4 = vpop.f32.mrb[17].mxu0  ;;  %1227 = vmatmul.mubr.bf16.gmra.mrb[36].mxu1 %v288_v61  ;;  %v244_v10 = vpop.f32.mrb[16].mxu1 }
  0xfa   :  { %v191_v6 = vpop.f32.mrb[18].mxu0  ;;  %1230 = vmatprep.mubr.msk.bf16.mxu1 %vm1487_vm0, %v1486_v1  ;;  %v245_v13 = vadd.f32 %v1716_v55, %v244_v10  ;;  %v1192_v14 = vpop.f32.mrb[17].mxu1 }
  0xfb   :  { %v192_v7 = vadd.f32 %v1716_v55, %v191_v6  ;;  %v1165_v8 = vpop.f32.mrb[19].mxu0  ;;  %v267_v11 = vmax.f32 %v189_v3, 0.0  ;;  %v247_v15 = vpop.f32.mrb[18].mxu1 }
  0xfc   :  { %v281_v18 = vmax.f32 %v245_v13, 0.0  ;;  %v248_v19 = vadd.f32 %v1716_v55, %v247_v15  ;;  %v1193_v20 = vpop.f32.mrb[19].mxu1 }
  0xfd   :  { %v268_v12 = vmax.f32 %v192_v7, 0.0 }
  0xfe   :  { %v282_v24 = vmax.f32 %v248_v19, 0.0 }
  0xff   :  { %v289_v16 = vpack.c.bf16 %v268_v12, %v267_v11 }
 0x100   :  { %v196_v21 = vpop.f32.mrb[20].mxu0  ;;  %v296_v28 = vpack.c.bf16 %v282_v24, %v281_v18 }
 0x101   :  { %v197_v22 = vadd.f32 %v1716_v55, %v196_v21  ;;  %v1168_v23 = vpop.f32.mrb[21].mxu0  ;;  %1231 = vmatmul.mubr.bf16.gmra.mrb[40].mxu1 %v289_v16  ;;  %v252_v29 = vpop.f32.mrb[20].mxu1 }
 0x102   :  { %v199_v25 = vpop.f32.mrb[22].mxu0  ;;  %1234 = vmatprep.mubr.msk.bf16.mxu1 %vm1487_vm0, %v1486_v1  ;;  %v253_v32 = vadd.f32 %v1716_v55, %v252_v29  ;;  %v1196_v33 = vpop.f32.mrb[21].mxu1 }
 0x103   :  { %v200_v26 = vadd.f32 %v1716_v55, %v199_v25  ;;  %v1169_v27 = vpop.f32.mrb[23].mxu0  ;;  %v269_v30 = vmax.f32 %v197_v22, 0.0  ;;  %v255_v34 = vpop.f32.mrb[22].mxu1 }
 0x104   :  { %v283_v37 = vmax.f32 %v253_v32, 0.0  ;;  %v256_v38 = vadd.f32 %v1716_v55, %v255_v34  ;;  %v1197_v39 = vpop.f32.mrb[23].mxu1 }
 0x105   :  { %v270_v31 = vmax.f32 %v200_v26, 0.0 }
 0x106   :  { %v284_v43 = vmax.f32 %v256_v38, 0.0 }
 0x107   :  { %v290_v36 = vpack.c.bf16 %v270_v31, %v269_v30 }
 0x108   :  { %v204_v40 = vpop.f32.mrb[24].mxu0  ;;  %v297_v47 = vpack.c.bf16 %v284_v43, %v283_v37 }
 0x109   :  { %v205_v41 = vadd.f32 %v1716_v55, %v204_v40  ;;  %v1172_v42 = vpop.f32.mrb[25].mxu0  ;;  %1235 = vmatmul.mubr.bf16.gmra.mrb[44].mxu1 %v290_v36 }
 0x10a   :  { %v207_v44 = vpop.f32.mrb[26].mxu0  ;;  %1238 = vmatprep.mubr.msk.bf16.mxu1 %vm1487_vm0, %v1486_v1 }
 0x10b   :  { %v208_v45 = vadd.f32 %v1716_v55, %v207_v44  ;;  %v1173_v46 = vpop.f32.mrb[27].mxu0  ;;  %v271_v48 = vmax.f32 %v205_v41, 0.0  ;;  %v1357_v55 = vld [vmem:[%s2096_s5 + $0x38] sm:$0xff]  }
 0x10c   :  { %1281 = vmatpush3.bf16.msra.mxu0 %v1357_v55 }
 0x10d   :  { %v272_v49 = vmax.f32 %v208_v45, 0.0 }
 0x10f   :  { %v291_v50 = vpack.c.bf16 %v272_v49, %v271_v48 }
 0x111   :  { %1239 = vmatmul.mubr.bf16.gmra.mrb[48].mxu1 %v291_v50 }
 0x112   :  { %1242 = vmatprep.mubr.msk.bf16.mxu1 %vm1487_vm0, %v1486_v1 }
 0x119   :  { %1243 = vmatmul.mubr.bf16.gmra.mrb[52].mxu1 %v1731_v17  ;;  %v1788_v17 = vld [vmem:[%s2095_s4] ss:$0 sm:$0xff] }
 0x11a   :  { %1246 = vmatprep.mubr.msk.bf16.mxu1 %vm1487_vm0, %v1486_v1 }
 0x121   :  { %1247 = vmatmul.mubr.bf16.gmra.mrb[56].mxu1 %v1739_v35 }
 0x122   :  { %1250 = vmatprep.mubr.msk.bf16.mxu1 %vm1487_vm0, %v1486_v1 }
 0x129   :  { %1251 = vmatmul.mubr.bf16.gmra.mrb[60].mxu1 %v1747_v53 }
 0x12a   :  { %1254 = vmatprep.mubr.msk.bf16.mxu1 %vm1487_vm0, %v1486_v1 }
 0x131   :  { %1255 = vmatmul.mubr.bf16.gmra.mrb[64].mxu1 %v295_v9 }
 0x132   :  { %1258 = vmatprep.mubr.msk.bf16.mxu1 %vm1487_vm0, %v1486_v1 }
 0x139   :  { %1259 = vmatmul.mubr.bf16.gmra.mrb[68].mxu1 %v296_v28 }
 0x13a   :  { %1262 = vmatprep.mubr.msk.bf16.mxu1 %vm1487_vm0, %v1486_v1 }
 0x141   :  { %1263 = vmatmul.mubr.bf16.gmra.mrb[72].mxu1 %v297_v47 }
 0x1b4   :  { %v403_v35 = vpop.f32.mrb[24].mxu1 }
 0x1b5   :  { %v404_v51 = vadd.f32 %v1788_v17, %v403_v35  ;;  %v1216_v52 = vpop.f32.mrb[25].mxu1 }
 0x1b6   :  { %v406_v53 = vpop.f32.mrb[26].mxu1 }
 0x1b7   :  { %v407_v54 = vadd.f32 %v1788_v17, %v406_v53  ;;  %v1217_v56 = vpop.f32.mrb[27].mxu1  ;;  %v506_v57 = vmax.f32 %v404_v51, 0.0 }
 0x1b9   :  { %v507_v58 = vmax.f32 %v407_v54, 0.0 }
 0x1bb   :  { %v532_v59 = vpack.c.bf16 %v507_v58, %v506_v57 }
 0x1bc   :  { %v411_v60 = vpop.f32.mrb[28].mxu1 }
 0x1bd   :  { %v412_v61 = vadd.f32 %v1788_v17, %v411_v60  ;;  %v1220_v62 = vpop.f32.mrb[29].mxu1  ;;  %1283 = vmatmul.mubr.bf16.vlgmr.msra.gmra.mrb[28].mxu0 %v532_v59 }
 0x1be   :  { %v414_v63 = vpop.f32.mrb[30].mxu1  ;;  %1286 = vmatprep.mubr.msk.bf16.mxu0 %vm1487_vm0, %v1486_v1 }
 0x1bf   :  { %v415_v0 = vadd.f32 %v1788_v17, %v414_v63  ;;  %v1221_v2 = vpop.f32.mrb[31].mxu1  ;;  %v508_v3 = vmax.f32 %v412_v61, 0.0 }
 0x1c1   :  { %v509_v4 = vmax.f32 %v415_v0, 0.0 }
 0x1c3   :  { %v533_v5 = vpack.c.bf16 %v509_v4, %v508_v3 }
 0x1c4   :  { %v419_v6 = vpop.f32.mrb[32].mxu1 }
 0x1c5   :  { %v420_v7 = vadd.f32 %v1788_v17, %v419_v6  ;;  %v1224_v8 = vpop.f32.mrb[33].mxu1  ;;  %1287 = vmatmul.mubr.bf16.gmra.mrb[32].mxu0 %v533_v5 }
 0x1c6   :  { %v422_v9 = vpop.f32.mrb[34].mxu1  ;;  %1290 = vmatprep.mubr.msk.bf16.mxu0 %vm1487_vm0, %v1486_v1 }
 0x1c7   :  { %v423_v10 = vadd.f32 %v1788_v17, %v422_v9  ;;  %v1225_v11 = vpop.f32.mrb[35].mxu1  ;;  %v510_v12 = vmax.f32 %v420_v7, 0.0 }
 0x1c9   :  { %v511_v13 = vmax.f32 %v423_v10, 0.0 }
 0x1cb   :  { %v534_v14 = vpack.c.bf16 %v511_v13, %v510_v12 }
 0x1cc   :  { %v427_v15 = vpop.f32.mrb[36].mxu1 }
 0x1cd   :  { %v428_v16 = vadd.f32 %v1788_v17, %v427_v15  ;;  %v1228_v18 = vpop.f32.mrb[37].mxu1  ;;  %1291 = vmatmul.mubr.bf16.gmra.mrb[36].mxu0 %v534_v14 }
 0x1ce   :  { %v430_v19 = vpop.f32.mrb[38].mxu1  ;;  %1294 = vmatprep.mubr.msk.bf16.mxu0 %vm1487_vm0, %v1486_v1 }
 0x1cf   :  { %v431_v20 = vadd.f32 %v1788_v17, %v430_v19  ;;  %v1229_v21 = vpop.f32.mrb[39].mxu1  ;;  %v512_v22 = vmax.f32 %v428_v16, 0.0 }
 0x1d1   :  { %v513_v23 = vmax.f32 %v431_v20, 0.0 }
 0x1d3   :  { %v535_v24 = vpack.c.bf16 %v513_v23, %v512_v22 }
 0x1d4   :  { %v435_v25 = vpop.f32.mrb[40].mxu1 }
 0x1d5   :  { %v436_v26 = vadd.f32 %v1788_v17, %v435_v25  ;;  %v1232_v27 = vpop.f32.mrb[41].mxu1  ;;  %1295 = vmatmul.mubr.bf16.gmra.mrb[40].mxu0 %v535_v24 }
 0x1d6   :  { %v438_v28 = vpop.f32.mrb[42].mxu1  ;;  %1298 = vmatprep.mubr.msk.bf16.mxu0 %vm1487_vm0, %v1486_v1 }
 0x1d7   :  { %v439_v29 = vadd.f32 %v1788_v17, %v438_v28  ;;  %v1233_v30 = vpop.f32.mrb[43].mxu1  ;;  %v514_v31 = vmax.f32 %v436_v26, 0.0 }
 0x1d9   :  { %v515_v32 = vmax.f32 %v439_v29, 0.0 }
 0x1db   :  { %v536_v33 = vpack.c.bf16 %v515_v32, %v514_v31 }
 0x1dc   :  { %v443_v34 = vpop.f32.mrb[44].mxu1 }
 0x1dd   :  { %v444_v36 = vadd.f32 %v1788_v17, %v443_v34  ;;  %v1236_v37 = vpop.f32.mrb[45].mxu1  ;;  %1299 = vmatmul.mubr.bf16.gmra.mrb[44].mxu0 %v536_v33 }
 0x1de   :  { %v446_v38 = vpop.f32.mrb[46].mxu1  ;;  %1302 = vmatprep.mubr.msk.bf16.mxu0 %vm1487_vm0, %v1486_v1 }
 0x1df   :  { %v447_v39 = vadd.f32 %v1788_v17, %v446_v38  ;;  %v1237_v40 = vpop.f32.mrb[47].mxu1  ;;  %v516_v41 = vmax.f32 %v444_v36, 0.0 }
 0x1e1   :  { %v517_v42 = vmax.f32 %v447_v39, 0.0 }
 0x1e3   :  { %v537_v43 = vpack.c.bf16 %v517_v42, %v516_v41 }
 0x1e4   :  { %v451_v44 = vpop.f32.mrb[48].mxu1 }
 0x1e5   :  { %v452_v45 = vadd.f32 %v1788_v17, %v451_v44  ;;  %v1240_v46 = vpop.f32.mrb[49].mxu1  ;;  %1303 = vmatmul.mubr.bf16.gmra.mrb[48].mxu0 %v537_v43 }
 0x1e6   :  { %v454_v47 = vpop.f32.mrb[50].mxu1  ;;  %1306 = vmatprep.mubr.msk.bf16.mxu0 %vm1487_vm0, %v1486_v1 }
 0x1e7   :  { %v455_v48 = vadd.f32 %v1788_v17, %v454_v47  ;;  %v1241_v49 = vpop.f32.mrb[51].mxu1  ;;  %v518_v50 = vmax.f32 %v452_v45, 0.0  ;;  %v1843_v45 = vld [vmem:[%s2097_s6] ss:$0 sm:$0xff] }
 0x1e9   :  { %v519_v55 = vmax.f32 %v455_v48, 0.0 }
 0x1eb   :  { %v538_v35 = vpack.c.bf16 %v519_v55, %v518_v50 }
 0x1ec   :  { %v459_v51 = vpop.f32.mrb[52].mxu1 }
 0x1ed   :  { %v460_v52 = vadd.f32 %v1788_v17, %v459_v51  ;;  %v1244_v53 = vpop.f32.mrb[53].mxu1  ;;  %1307 = vmatmul.mubr.bf16.gmra.mrb[52].mxu0 %v538_v35 }
 0x1ee   :  { %v462_v54 = vpop.f32.mrb[54].mxu1  ;;  %1310 = vmatprep.mubr.msk.bf16.mxu0 %vm1487_vm0, %v1486_v1 }
 0x1ef   :  { %v463_v56 = vadd.f32 %v1788_v17, %v462_v54  ;;  %v1245_v57 = vpop.f32.mrb[55].mxu1  ;;  %v520_v58 = vmax.f32 %v460_v52, 0.0 }
 0x1f1   :  { %v521_v59 = vmax.f32 %v463_v56, 0.0 }
 0x1f3   :  { %v539_v60 = vpack.c.bf16 %v521_v59, %v520_v58 }
 0x1f4   :  { %v467_v61 = vpop.f32.mrb[56].mxu1 }
 0x1f5   :  { %v468_v62 = vadd.f32 %v1788_v17, %v467_v61  ;;  %v1248_v63 = vpop.f32.mrb[57].mxu1  ;;  %1311 = vmatmul.mubr.bf16.gmra.mrb[56].mxu0 %v539_v60 }
 0x1f6   :  { %v470_v0 = vpop.f32.mrb[58].mxu1  ;;  %1314 = vmatprep.mubr.msk.bf16.mxu0 %vm1487_vm0, %v1486_v1 }
 0x1f7   :  { %v471_v2 = vadd.f32 %v1788_v17, %v470_v0  ;;  %v1249_v3 = vpop.f32.mrb[59].mxu1  ;;  %v522_v4 = vmax.f32 %v468_v62, 0.0 }
 0x1f9   :  { %v523_v5 = vmax.f32 %v471_v2, 0.0 }
 0x1fb   :  { %v540_v6 = vpack.c.bf16 %v523_v5, %v522_v4 }
 0x1fc   :  { %v475_v7 = vpop.f32.mrb[60].mxu1 }
 0x1fd   :  { %v476_v8 = vadd.f32 %v1788_v17, %v475_v7  ;;  %v1252_v9 = vpop.f32.mrb[61].mxu1  ;;  %1315 = vmatmul.mubr.bf16.gmra.mrb[60].mxu0 %v540_v6 }
 0x1fe   :  { %v478_v10 = vpop.f32.mrb[62].mxu1  ;;  %1318 = vmatprep.mubr.msk.bf16.mxu0 %vm1487_vm0, %v1486_v1 }
 0x1ff   :  { %v479_v11 = vadd.f32 %v1788_v17, %v478_v10  ;;  %v1253_v12 = vpop.f32.mrb[63].mxu1  ;;  %v524_v13 = vmax.f32 %v476_v8, 0.0 }
 0x201   :  { %v525_v14 = vmax.f32 %v479_v11, 0.0 }
 0x203   :  { %v541_v15 = vpack.c.bf16 %v525_v14, %v524_v13 }
 0x204   :  { %v483_v16 = vpop.f32.mrb[64].mxu1 }
 0x205   :  { %v484_v18 = vadd.f32 %v1788_v17, %v483_v16  ;;  %v1256_v19 = vpop.f32.mrb[65].mxu1  ;;  %1319 = vmatmul.mubr.bf16.gmra.mrb[64].mxu0 %v541_v15 }
 0x206   :  { %v486_v20 = vpop.f32.mrb[66].mxu1  ;;  %1322 = vmatprep.mubr.msk.bf16.mxu0 %vm1487_vm0, %v1486_v1 }
 0x207   :  { %v487_v21 = vadd.f32 %v1788_v17, %v486_v20  ;;  %v1257_v22 = vpop.f32.mrb[67].mxu1  ;;  %v526_v23 = vmax.f32 %v484_v18, 0.0 }
 0x209   :  { %v527_v24 = vmax.f32 %v487_v21, 0.0 }
 0x20b   :  { %v542_v25 = vpack.c.bf16 %v527_v24, %v526_v23 }
 0x20c   :  { %v491_v26 = vpop.f32.mrb[68].mxu1 }
 0x20d   :  { %v492_v27 = vadd.f32 %v1788_v17, %v491_v26  ;;  %v1260_v28 = vpop.f32.mrb[69].mxu1  ;;  %1323 = vmatmul.mubr.bf16.gmra.mrb[68].mxu0 %v542_v25 }
 0x20e   :  { %v494_v29 = vpop.f32.mrb[70].mxu1  ;;  %1326 = vmatprep.mubr.msk.bf16.mxu0 %vm1487_vm0, %v1486_v1 }
 0x20f   :  { %v495_v30 = vadd.f32 %v1788_v17, %v494_v29  ;;  %v1261_v31 = vpop.f32.mrb[71].mxu1  ;;  %v528_v32 = vmax.f32 %v492_v27, 0.0 }
 0x211   :  { %v529_v33 = vmax.f32 %v495_v30, 0.0 }
 0x213   :  { %v543_v34 = vpack.c.bf16 %v529_v33, %v528_v32 }
 0x214   :  { %v499_v36 = vpop.f32.mrb[72].mxu1 }
 0x215   :  { %v500_v37 = vadd.f32 %v1788_v17, %v499_v36  ;;  %v1264_v38 = vpop.f32.mrb[73].mxu1  ;;  %1327 = vmatmul.mubr.bf16.gmra.mrb[72].mxu0 %v543_v34 }
 0x216   :  { %v502_v39 = vpop.f32.mrb[74].mxu1  ;;  %1330 = vmatprep.mubr.msk.bf16.mxu0 %vm1487_vm0, %v1486_v1 }
 0x217   :  { %v503_v40 = vadd.f32 %v1788_v17, %v502_v39  ;;  %v1265_v41 = vpop.f32.mrb[75].mxu1  ;;  %v530_v42 = vmax.f32 %v500_v37, 0.0 }
 0x219   :  { %v531_v43 = vmax.f32 %v503_v40, 0.0 }
 0x21b   :  { %v544_v44 = vpack.c.bf16 %v531_v43, %v530_v42 }
 0x21d   :  { %1331 = vmatmul.mubr.bf16.gmra.mrb[76].mxu0 %v544_v44 }
 0x290   :  { %v650_v46 = vpop.f32.mrb[28].mxu0 }
 0x291   :  { %v1846_v47 = vadd.f32 %v1843_v45, %v650_v46  ;;  %v1284_v48 = vpop.f32.mrb[29].mxu0 }
 0x292   :  { %v653_v49 = vpop.f32.mrb[30].mxu0 }
 0x293   :  { %753 = vmax.xlane.f32.xlu0 %v1846_v47  ;;  %v1285_v1 = vpop.f32.mrb[31].mxu0  ;;  %v1850_v17 = vadd.f32 %v1843_v45, %v653_v49 }
 0x297   :  { %755 = vmax.xlane.f32.xlu0 %v1850_v17 }
 0x298   :  { %v658_v50 = vpop.f32.mrb[32].mxu0 }
 0x299   :  { %v1854_v55 = vadd.f32 %v1843_v45, %v658_v50  ;;  %v1288_v35 = vpop.f32.mrb[33].mxu0 }
 0x29a   :  { %v661_v51 = vpop.f32.mrb[34].mxu0 }
 0x29b   :  { %757 = vmax.xlane.f32.xlu1 %v1854_v55  ;;  %v1289_v52 = vpop.f32.mrb[35].mxu0  ;;  %v1858_v53 = vadd.f32 %v1843_v45, %v661_v51 }
 0x29f   :  { %759 = vmax.xlane.f32.xlu1 %v1858_v53 }
 0x2a0   :  { %v666_v54 = vpop.f32.mrb[36].mxu0 }
 0x2a1   :  { %v1862_v56 = vadd.f32 %v1843_v45, %v666_v54  ;;  %v1292_v57 = vpop.f32.mrb[37].mxu0 }
 0x2a2   :  { %v669_v58 = vpop.f32.mrb[38].mxu0 }
 0x2a3   :  { %v1865_v59 = vadd.f32 %v1843_v45, %v669_v58  ;;  %761 = vmax.xlane.f32.xlu0 %v1862_v56  ;;  %v1293_v60 = vpop.f32.mrb[39].mxu0 }
 0x2a5   :  { %763 = vmax.xlane.f32.xlu1 %v1865_v59 }
 0x2a8   :  { %v674_v61 = vpop.f32.mrb[40].mxu0 }
 0x2a9   :  { %v1870_v62 = vadd.f32 %v1843_v45, %v674_v61  ;;  %v1296_v63 = vpop.f32.mrb[41].mxu0 }
 0x2aa   :  { %v677_v0 = vpop.f32.mrb[42].mxu0 }
 0x2ab   :  { %v1873_v2 = vadd.f32 %v1843_v45, %v677_v0  ;;  %765 = vmax.xlane.f32.xlu0 %v1870_v62  ;;  %v1297_v3 = vpop.f32.mrb[43].mxu0 }
 0x2ad   :  { %767 = vmax.xlane.f32.xlu1 %v1873_v2 }
 0x2b0   :  { %v682_v4 = vpop.f32.mrb[44].mxu0 }
 0x2b1   :  { %v1878_v5 = vadd.f32 %v1843_v45, %v682_v4  ;;  %v1300_v6 = vpop.f32.mrb[45].mxu0 }
 0x2b2   :  { %v685_v7 = vpop.f32.mrb[46].mxu0 }
 0x2b3   :  { %v1881_v8 = vadd.f32 %v1843_v45, %v685_v7  ;;  %769 = vmax.xlane.f32.xlu0 %v1878_v5  ;;  %v1301_v9 = vpop.f32.mrb[47].mxu0 }
 0x2b5   :  { %771 = vmax.xlane.f32.xlu1 %v1881_v8 }
 0x2b8   :  { %v690_v10 = vpop.f32.mrb[48].mxu0 }
 0x2b9   :  { %v1886_v11 = vadd.f32 %v1843_v45, %v690_v10  ;;  %v1304_v12 = vpop.f32.mrb[49].mxu0 }
 0x2ba   :  { %v693_v13 = vpop.f32.mrb[50].mxu0 }
 0x2bb   :  { %v1889_v14 = vadd.f32 %v1843_v45, %v693_v13  ;;  %773 = vmax.xlane.f32.xlu0 %v1886_v11  ;;  %v1305_v15 = vpop.f32.mrb[51].mxu0 }
 0x2bd   :  { %775 = vmax.xlane.f32.xlu1 %v1889_v14 }
 0x2c0   :  { %v698_v16 = vpop.f32.mrb[52].mxu0 }
 0x2c1   :  { %v1894_v18 = vadd.f32 %v1843_v45, %v698_v16  ;;  %v1308_v19 = vpop.f32.mrb[53].mxu0 }
 0x2c2   :  { %v701_v20 = vpop.f32.mrb[54].mxu0 }
 0x2c3   :  { %v1897_v21 = vadd.f32 %v1843_v45, %v701_v20  ;;  %777 = vmax.xlane.f32.xlu0 %v1894_v18  ;;  %v1309_v22 = vpop.f32.mrb[55].mxu0 }
 0x2c5   :  { %779 = vmax.xlane.f32.xlu1 %v1897_v21 }
 0x2c8   :  { %v706_v23 = vpop.f32.mrb[56].mxu0 }
 0x2c9   :  { %v1902_v24 = vadd.f32 %v1843_v45, %v706_v23  ;;  %v1312_v25 = vpop.f32.mrb[57].mxu0 }
 0x2ca   :  { %v709_v26 = vpop.f32.mrb[58].mxu0 }
 0x2cb   :  { %v1905_v27 = vadd.f32 %v1843_v45, %v709_v26  ;;  %781 = vmax.xlane.f32.xlu0 %v1902_v24  ;;  %v1313_v28 = vpop.f32.mrb[59].mxu0 }
 0x2cd   :  { %783 = vmax.xlane.f32.xlu1 %v1905_v27 }
 0x2d0   :  { %v714_v29 = vpop.f32.mrb[60].mxu0 }
 0x2d1   :  { %v1910_v30 = vadd.f32 %v1843_v45, %v714_v29  ;;  %v1316_v31 = vpop.f32.mrb[61].mxu0 }
 0x2d2   :  { %v717_v32 = vpop.f32.mrb[62].mxu0 }
 0x2d3   :  { %v1913_v33 = vadd.f32 %v1843_v45, %v717_v32  ;;  %785 = vmax.xlane.f32.xlu0 %v1910_v30  ;;  %v1317_v34 = vpop.f32.mrb[63].mxu0 }
 0x2d5   :  { %787 = vmax.xlane.f32.xlu1 %v1913_v33 }
 0x2d8   :  { %v722_v36 = vpop.f32.mrb[64].mxu0 }
 0x2d9   :  { %v1918_v37 = vadd.f32 %v1843_v45, %v722_v36  ;;  %v1320_v38 = vpop.f32.mrb[65].mxu0 }
 0x2da   :  { %v725_v39 = vpop.f32.mrb[66].mxu0 }
 0x2db   :  { %v1921_v40 = vadd.f32 %v1843_v45, %v725_v39  ;;  %789 = vmax.xlane.f32.xlu0 %v1918_v37  ;;  %v1321_v41 = vpop.f32.mrb[67].mxu0 }
 0x2dd   :  { %791 = vmax.xlane.f32.xlu1 %v1921_v40 }
 0x2e0   :  { %v730_v42 = vpop.f32.mrb[68].mxu0 }
 0x2e1   :  { %v1926_v43 = vadd.f32 %v1843_v45, %v730_v42  ;;  %v1324_v44 = vpop.f32.mrb[69].mxu0 }
 0x2e2   :  { %v733_v46 = vpop.f32.mrb[70].mxu0 }
 0x2e3   :  { %v1929_v48 = vadd.f32 %v1843_v45, %v733_v46  ;;  %793 = vmax.xlane.f32.xlu0 %v1926_v43  ;;  %v1325_v49 = vpop.f32.mrb[71].mxu0 }
 0x2e5   :  { %795 = vmax.xlane.f32.xlu1 %v1929_v48 }
 0x2e8   :  { %v738_v1 = vpop.f32.mrb[72].mxu0 }
 0x2e9   :  { %v1934_v50 = vadd.f32 %v1843_v45, %v738_v1  ;;  %v1328_v35 = vpop.f32.mrb[73].mxu0 }
 0x2ea   :  { %v741_v51 = vpop.f32.mrb[74].mxu0 }
 0x2eb   :  { %v1937_v52 = vadd.f32 %v1843_v45, %v741_v51  ;;  %797 = vmax.xlane.f32.xlu0 %v1934_v50  ;;  %v1329_v54 = vpop.f32.mrb[75].mxu0 }
 0x2ed   :  { %799 = vmax.xlane.f32.xlu1 %v1937_v52 }
 0x2f0   :  { %v746_v57 = vpop.f32.mrb[76].mxu0 }
 0x2f1   :  { %v1942_v58 = vadd.f32 %v1843_v45, %v746_v57  ;;  %v1332_v60 = vpop.f32.mrb[77].mxu0 }
 0x2f2   :  { %v749_v61 = vpop.f32.mrb[78].mxu0 }
 0x2f3   :  { %v1945_v63 = vadd.f32 %v1843_v45, %v749_v61  ;;  %801 = vmax.xlane.f32.xlu0 %v1942_v58  ;;  %v1333_v0 = vpop.f32.mrb[79].mxu0 }
 0x2f5   :  { %803 = vmax.xlane.f32.xlu1 %v1945_v63 }
 0x320   :  { %v754_v3 = vpop.xlane.xlu0 %753 }
 0x321   :  { %v1950_v4 = vsub.f32 %v1846_v47, %v754_v3 }
 0x323   :  { %v831_v6 = vmul.f32 1.442695, %v1950_v4 }
 0x324   :  { %v756_v7 = vpop.xlane.xlu0 %755 }
 0x325   :  { %1358 = vpow2.f32 %v831_v6  ;;  %v1954_v9 = vsub.f32 %v1850_v17, %v756_v7 }
 0x327   :  { %v833_v10 = vmul.f32 1.442695, %v1954_v9 }
 0x328   :  { %v758_v45 = vpop.xlane.xlu1 %757 }
 0x329   :  { %1360 = vpow2.f32 %v833_v10  ;;  %v1958_v12 = vsub.f32 %v1854_v55, %v758_v45 }
 0x32b   :  { %v835_v13 = vmul.f32 1.442695, %v1958_v12 }
 0x32c   :  { %v760_v15 = vpop.xlane.xlu1 %759 }
 0x32d   :  { %1362 = vpow2.f32 %v835_v13  ;;  %v1962_v47 = vsub.f32 %v1858_v53, %v760_v15 }
 0x32f   :  { %v1359_v16 = vpop.eup %1358  ;;  %v837_v19 = vmul.f32 1.442695, %v1962_v47 }
 0x330   :  { %v762_v20 = vpop.xlane.xlu0 %761  ;;  %883 = vadd.xlane.f32.xlu0 %v1359_v16 }
 0x331   :  { %1364 = vpow2.f32 %v837_v19  ;;  %v1966_v17 = vsub.f32 %v1862_v56, %v762_v20 }
 0x332   :  { %v764_v22 = vpop.xlane.xlu1 %763 }
 0x333   :  { %v1361_v23 = vpop.eup %1360  ;;  %v839_v55 = vmul.f32 1.442695, %v1966_v17  ;;  %v1970_v25 = vsub.f32 %v1865_v59, %v764_v22 }
 0x334   :  { %885 = vadd.xlane.f32.xlu1 %v1361_v23 }
 0x335   :  { %1366 = vpow2.f32 %v839_v55  ;;  %v841_v53 = vmul.f32 1.442695, %v1970_v25 }
 0x337   :  { %v1363_v26 = vpop.eup %1362  ;;  %1368 = vpow2.f32 %v841_v53 }
 0x338   :  { %v766_v28 = vpop.xlane.xlu0 %765  ;;  %887 = vadd.xlane.f32.xlu0 %v1363_v26 }
 0x339   :  { %v1974_v29 = vsub.f32 %v1870_v62, %v766_v28 }
 0x33a   :  { %v768_v56 = vpop.xlane.xlu1 %767 }
 0x33b   :  { %v1365_v31 = vpop.eup %1364  ;;  %v843_v32 = vmul.f32 1.442695, %v1974_v29  ;;  %v1978_v34 = vsub.f32 %v1873_v2, %v768_v56 }
 0x33c   :  { %889 = vadd.xlane.f32.xlu1 %v1365_v31 }
 0x33d   :  { %1370 = vpow2.f32 %v843_v32  ;;  %v845_v59 = vmul.f32 1.442695, %v1978_v34 }
 0x33f   :  { %v1367_v36 = vpop.eup %1366  ;;  %1372 = vpow2.f32 %v845_v59 }
 0x340   :  { %v770_v38 = vpop.xlane.xlu0 %769  ;;  %891 = vadd.xlane.f32.xlu0 %v1367_v36 }
 0x341   :  { %v1369_v39 = vpop.eup %1368  ;;  %v1982_v41 = vsub.f32 %v1878_v5, %v770_v38 }
 0x342   :  { %v772_v62 = vpop.xlane.xlu1 %771  ;;  %893 = vadd.xlane.f32.xlu1 %v1369_v39 }
 0x343   :  { %v847_v42 = vmul.f32 1.442695, %v1982_v41  ;;  %v1986_v44 = vsub.f32 %v1881_v8, %v772_v62 }
 0x345   :  { %1374 = vpow2.f32 %v847_v42  ;;  %v849_v2 = vmul.f32 1.442695, %v1986_v44 }
 0x347   :  { %v1371_v46 = vpop.eup %1370  ;;  %1376 = vpow2.f32 %v849_v2 }
 0x348   :  { %v774_v49 = vpop.xlane.xlu0 %773  ;;  %895 = vadd.xlane.f32.xlu0 %v1371_v46 }
 0x349   :  { %v1373_v1 = vpop.eup %1372  ;;  %v1990_v35 = vsub.f32 %v1886_v11, %v774_v49 }
 0x34a   :  { %v776_v5 = vpop.xlane.xlu1 %775  ;;  %897 = vadd.xlane.f32.xlu1 %v1373_v1 }
 0x34b   :  { %v851_v51 = vmul.f32 1.442695, %v1990_v35  ;;  %v1994_v54 = vsub.f32 %v1889_v14, %v776_v5 }
 0x34d   :  { %1378 = vpow2.f32 %v851_v51  ;;  %v853_v8 = vmul.f32 1.442695, %v1994_v54 }
 0x34f   :  { %v1375_v57 = vpop.eup %1374  ;;  %1380 = vpow2.f32 %v853_v8 }
 0x350   :  { %v778_v60 = vpop.xlane.xlu0 %777  ;;  %899 = vadd.xlane.f32.xlu0 %v1375_v57 }
 0x351   :  { %v1377_v61 = vpop.eup %1376  ;;  %v1998_v0 = vsub.f32 %v1894_v18, %v778_v60 }
 0x352   :  { %v780_v11 = vpop.xlane.xlu1 %779  ;;  %901 = vadd.xlane.f32.xlu1 %v1377_v61 }
 0x353   :  { %v855_v3 = vmul.f32 1.442695, %v1998_v0  ;;  %v2002_v6 = vsub.f32 %v1897_v21, %v780_v11 }
 0x355   :  { %1382 = vpow2.f32 %v855_v3  ;;  %v857_v14 = vmul.f32 1.442695, %v2002_v6 }
 0x357   :  { %v1379_v7 = vpop.eup %1378  ;;  %1384 = vpow2.f32 %v857_v14 }
 0x358   :  { %v782_v10 = vpop.xlane.xlu0 %781  ;;  %903 = vadd.xlane.f32.xlu0 %v1379_v7 }
 0x359   :  { %v1381_v45 = vpop.eup %1380  ;;  %v2006_v13 = vsub.f32 %v1902_v24, %v782_v10 }
 0x35a   :  { %v784_v18 = vpop.xlane.xlu1 %783  ;;  %905 = vadd.xlane.f32.xlu1 %v1381_v45 }
 0x35b   :  { %v859_v15 = vmul.f32 1.442695, %v2006_v13  ;;  %v2010_v16 = vsub.f32 %v1905_v27, %v784_v18 }
 0x35d   :  { %1386 = vpow2.f32 %v859_v15  ;;  %v861_v21 = vmul.f32 1.442695, %v2010_v16 }
 0x35f   :  { %v1383_v19 = vpop.eup %1382  ;;  %1388 = vpow2.f32 %v861_v21 }
 0x360   :  { %v786_v20 = vpop.xlane.xlu0 %785  ;;  %907 = vadd.xlane.f32.xlu0 %v1383_v19 }
 0x361   :  { %v1385_v22 = vpop.eup %1384  ;;  %v2014_v23 = vsub.f32 %v1910_v30, %v786_v20 }
 0x362   :  { %v788_v24 = vpop.xlane.xlu1 %787  ;;  %909 = vadd.xlane.f32.xlu1 %v1385_v22 }
 0x363   :  { %v863_v55 = vmul.f32 1.442695, %v2014_v23  ;;  %v2018_v53 = vsub.f32 %v1913_v33, %v788_v24 }
 0x365   :  { %1390 = vpow2.f32 %v863_v55  ;;  %v865_v27 = vmul.f32 1.442695, %v2018_v53 }
 0x367   :  { %v1387_v26 = vpop.eup %1386  ;;  %1392 = vpow2.f32 %v865_v27 }
 0x368   :  { %v790_v28 = vpop.xlane.xlu0 %789  ;;  %911 = vadd.xlane.f32.xlu0 %v1387_v26 }
 0x369   :  { %v1389_v56 = vpop.eup %1388  ;;  %v2022_v31 = vsub.f32 %v1918_v37, %v790_v28 }
 0x36a   :  { %v792_v30 = vpop.xlane.xlu1 %791  ;;  %913 = vadd.xlane.f32.xlu1 %v1389_v56 }
 0x36b   :  { %v867_v32 = vmul.f32 1.442695, %v2022_v31  ;;  %v2026_v59 = vsub.f32 %v1921_v40, %v792_v30 }
 0x36d   :  { %1394 = vpow2.f32 %v867_v32  ;;  %v869_v33 = vmul.f32 1.442695, %v2026_v59 }
 0x36f   :  { %v1391_v36 = vpop.eup %1390  ;;  %1396 = vpow2.f32 %v869_v33 }
 0x370   :  { %v794_v38 = vpop.xlane.xlu0 %793  ;;  %915 = vadd.xlane.f32.xlu0 %v1391_v36 }
 0x371   :  { %v1393_v39 = vpop.eup %1392  ;;  %v2030_v62 = vsub.f32 %v1926_v43, %v794_v38 }
 0x372   :  { %v796_v37 = vpop.xlane.xlu1 %795  ;;  %917 = vadd.xlane.f32.xlu1 %v1393_v39 }
 0x373   :  { %v871_v42 = vmul.f32 1.442695, %v2030_v62  ;;  %v2034_v2 = vsub.f32 %v1929_v48, %v796_v37 }
 0x375   :  { %1398 = vpow2.f32 %v871_v42  ;;  %v873_v40 = vmul.f32 1.442695, %v2034_v2 }
 0x377   :  { %v1395_v46 = vpop.eup %1394  ;;  %1400 = vpow2.f32 %v873_v40 }
 0x378   :  { %v798_v49 = vpop.xlane.xlu0 %797  ;;  %919 = vadd.xlane.f32.xlu0 %v1395_v46 }
 0x379   :  { %v1397_v1 = vpop.eup %1396  ;;  %v2038_v5 = vsub.f32 %v1934_v50, %v798_v49 }
 0x37a   :  { %v800_v43 = vpop.xlane.xlu1 %799  ;;  %921 = vadd.xlane.f32.xlu1 %v1397_v1 }
 0x37b   :  { %v875_v51 = vmul.f32 1.442695, %v2038_v5  ;;  %v2042_v8 = vsub.f32 %v1937_v52, %v800_v43 }
 0x37d   :  { %1402 = vpow2.f32 %v875_v51  ;;  %v877_v48 = vmul.f32 1.442695, %v2042_v8 }
 0x37f   :  { %v1399_v57 = vpop.eup %1398  ;;  %1404 = vpow2.f32 %v877_v48 }
 0x380   :  { %923 = vadd.xlane.f32.xlu0 %v1399_v57  ;;  %v802_v60 = vpop.xlane.xlu0 %801 }
 0x381   :  { %v1401_v61 = vpop.eup %1400  ;;  %v2046_v11 = vsub.f32 %v1942_v58, %v802_v60 }
 0x382   :  { %925 = vadd.xlane.f32.xlu1 %v1401_v61  ;;  %v804_v50 = vpop.xlane.xlu1 %803 }
 0x383   :  { %v879_v3 = vmul.f32 1.442695, %v2046_v11  ;;  %v2050_v14 = vsub.f32 %v1945_v63, %v804_v50 }
 0x385   :  { %1406 = vpow2.f32 %v879_v3  ;;  %v881_v52 = vmul.f32 1.442695, %v2050_v14 }
 0x387   :  { %v1403_v7 = vpop.eup %1402  ;;  %1408 = vpow2.f32 %v881_v52 }
 0x388   :  { %927 = vadd.xlane.f32.xlu0 %v1403_v7 }
 0x389   :  { %v1405_v10 = vpop.eup %1404 }
 0x38a   :  { %929 = vadd.xlane.f32.xlu1 %v1405_v10 }
 0x38f   :  { %v1407_v45 = vpop.eup %1406 }
 0x390   :  { %931 = vadd.xlane.f32.xlu0 %v1407_v45 }
 0x391   :  { %v1409_v18 = vpop.eup %1408 }
 0x392   :  { %933 = vadd.xlane.f32.xlu1 %v1409_v18 }
 0x3bd   :  { %v884_v58 = vpop.xlane.xlu0 %883 }
 0x3be   :  { %1410 = vlog2.f32 %v884_v58 }
 0x3c1   :  { %v886_v15 = vpop.xlane.xlu1 %885 }
 0x3c2   :  { %1412 = vlog2.f32 %v886_v15 }
 0x3c5   :  { %v888_v21 = vpop.xlane.xlu0 %887 }
 0x3c6   :  { %1414 = vlog2.f32 %v888_v21 }
 0x3c8   :  { %v1411_v63 = vpop.eup %1410 }
 0x3c9   :  { %v936_v19 = vmul.f32 0.6931472, %v1411_v63  ;;  %v890_v20 = vpop.xlane.xlu1 %889 }
 0x3ca   :  { %1416 = vlog2.f32 %v890_v20 }
 0x3cb   :  { %v987_v22 = vsub.f32 %v1950_v4, %v936_v19 }
 0x3cc   :  { %v1413_v24 = vpop.eup %1412 }
 0x3cd   :  { %1013 = vst [vmem:[#allocation2] sm:$0xff] %v987_v22  ;;  %v938_v55 = vmul.f32 0.6931472, %v1413_v24  ;;  %v892_v27 = vpop.xlane.xlu0 %891 }
 0x3ce   :  { %1418 = vlog2.f32 %v892_v27 }
 0x3cf   :  { %v988_v26 = vsub.f32 %v1954_v9, %v938_v55  ;;  %v894_v28 = vpop.xlane.xlu1 %893 }
 0x3d0   :  { %v1415_v56 = vpop.eup %1414  ;;  %1420 = vlog2.f32 %v894_v28 }
 0x3d1   :  { %1014 = vst [vmem:[#allocation2 + $0x8] sm:$0xff] %v988_v26  ;;  %v940_v30 = vmul.f32 0.6931472, %v1415_v56 }
 0x3d3   :  { %v989_v32 = vsub.f32 %v1958_v12, %v940_v30 }
 0x3d4   :  { %v1417_v33 = vpop.eup %1416 }
 0x3d5   :  { %1015 = vst [vmem:[#allocation2 + $0x10] sm:$0xff] %v989_v32  ;;  %v942_v36 = vmul.f32 0.6931472, %v1417_v33  ;;  %v896_v38 = vpop.xlane.xlu0 %895 }
 0x3d6   :  { %1422 = vlog2.f32 %v896_v38 }
 0x3d7   :  { %v990_v4 = vsub.f32 %v1962_v47, %v942_v36  ;;  %v898_v39 = vpop.xlane.xlu1 %897 }
 0x3d8   :  { %v1419_v37 = vpop.eup %1418  ;;  %1424 = vlog2.f32 %v898_v39 }
 0x3d9   :  { %1016 = vst [vmem:[#allocation2 + $0x18] sm:$0xff] %v990_v4  ;;  %v944_v42 = vmul.f32 0.6931472, %v1419_v37 }
 0x3da   :  { %v1421_v9 = vpop.eup %1420 }
 0x3db   :  { %v991_v40 = vsub.f32 %v1966_v17, %v944_v42  ;;  %v946_v46 = vmul.f32 0.6931472, %v1421_v9 }
 0x3dd   :  { %1017 = vst [vmem:[#allocation2 + $0x20] sm:$0xff] %v991_v40  ;;  %v992_v49 = vsub.f32 %v1970_v25, %v946_v46  ;;  %v900_v12 = vpop.xlane.xlu0 %899 }
 0x3de   :  { %1426 = vlog2.f32 %v900_v12 }
 0x3df   :  { %1018 = vst [vmem:[#allocation2 + $0x28] sm:$0xff] %v992_v49  ;;  %v902_v1 = vpop.xlane.xlu1 %901 }
 0x3e0   :  { %v1423_v43 = vpop.eup %1422  ;;  %1428 = vlog2.f32 %v902_v1 }
 0x3e1   :  { %v948_v51 = vmul.f32 0.6931472, %v1423_v43 }
 0x3e2   :  { %v1425_v47 = vpop.eup %1424 }
 0x3e3   :  { %v993_v48 = vsub.f32 %v1974_v29, %v948_v51  ;;  %v950_v57 = vmul.f32 0.6931472, %v1425_v47 }
 0x3e5   :  { %1019 = vst [vmem:[#allocation2 + $0x30] sm:$0xff] %v993_v48  ;;  %v994_v60 = vsub.f32 %v1978_v34, %v950_v57  ;;  %v904_v61 = vpop.xlane.xlu0 %903 }
 0x3e6   :  { %1430 = vlog2.f32 %v904_v61 }
 0x3e7   :  { %1020 = vst [vmem:[#allocation2 + $0x38] sm:$0xff] %v994_v60  ;;  %v906_v17 = vpop.xlane.xlu1 %905 }
 0x3e8   :  { %v1427_v50 = vpop.eup %1426  ;;  %1432 = vlog2.f32 %v906_v17 }
 0x3e9   :  { %v952_v25 = vmul.f32 0.6931472, %v1427_v50 }
 0x3ea   :  { %v1429_v3 = vpop.eup %1428 }
 0x3eb   :  { %v995_v52 = vsub.f32 %v1982_v41, %v952_v25  ;;  %v954_v7 = vmul.f32 0.6931472, %v1429_v3 }
 0x3ed   :  { %1021 = vst [vmem:[#allocation2 + $0x40] sm:$0xff] %v995_v52  ;;  %v996_v10 = vsub.f32 %v1986_v44, %v954_v7  ;;  %v908_v45 = vpop.xlane.xlu0 %907 }
 0x3ee   :  { %1434 = vlog2.f32 %v908_v45 }
 0x3ef   :  { %1022 = vst [vmem:[#allocation2 + $0x48] sm:$0xff] %v996_v10  ;;  %v910_v29 = vpop.xlane.xlu1 %909 }
 0x3f0   :  { %v1431_v18 = vpop.eup %1430  ;;  %1436 = vlog2.f32 %v910_v29 }
 0x3f1   :  { %v956_v34 = vmul.f32 0.6931472, %v1431_v18 }
 0x3f2   :  { %v1433_v58 = vpop.eup %1432 }
 0x3f3   :  { %v997_v15 = vsub.f32 %v1990_v35, %v956_v34  ;;  %v958_v21 = vmul.f32 0.6931472, %v1433_v58 }
 0x3f5   :  { %1023 = vst [vmem:[#allocation2 + $0x50] sm:$0xff] %v997_v15  ;;  %v998_v63 = vsub.f32 %v1994_v54, %v958_v21  ;;  %v912_v19 = vpop.xlane.xlu0 %911 }
 0x3f6   :  { %1438 = vlog2.f32 %v912_v19 }
 0x3f7   :  { %1024 = vst [vmem:[#allocation2 + $0x58] sm:$0xff] %v998_v63  ;;  %v914_v41 = vpop.xlane.xlu1 %913 }
 0x3f8   :  { %v1435_v20 = vpop.eup %1434  ;;  %1440 = vlog2.f32 %v914_v41 }
 0x3f9   :  { %v960_v44 = vmul.f32 0.6931472, %v1435_v20 }
 0x3fa   :  { %v1437_v22 = vpop.eup %1436 }
 0x3fb   :  { %v999_v24 = vsub.f32 %v1998_v0, %v960_v44  ;;  %v962_v55 = vmul.f32 0.6931472, %v1437_v22 }
 0x3fd   :  { %1025 = vst [vmem:[#allocation2 + $0x60] sm:$0xff] %v999_v24  ;;  %v1000_v27 = vsub.f32 %v2002_v6, %v962_v55  ;;  %v916_v26 = vpop.xlane.xlu0 %915 }
 0x3fe   :  { %1442 = vlog2.f32 %v916_v26 }
 0x3ff   :  { %1026 = vst [vmem:[#allocation2 + $0x68] sm:$0xff] %v1000_v27  ;;  %v918_v35 = vpop.xlane.xlu1 %917 }
 0x400   :  { %v1439_v28 = vpop.eup %1438  ;;  %1444 = vlog2.f32 %v918_v35 }
 0x401   :  { %v964_v54 = vmul.f32 0.6931472, %v1439_v28 }
 0x402   :  { %v1441_v56 = vpop.eup %1440 }
 0x403   :  { %v1001_v30 = vsub.f32 %v2006_v13, %v964_v54  ;;  %v966_v32 = vmul.f32 0.6931472, %v1441_v56 }
 0x405   :  { %1027 = vst [vmem:[#allocation2 + $0x70] sm:$0xff] %v1001_v30  ;;  %v1002_v33 = vsub.f32 %v2010_v16, %v966_v32  ;;  %v920_v36 = vpop.xlane.xlu0 %919 }
 0x406   :  { %1446 = vlog2.f32 %v920_v36 }
 0x407   :  { %1028 = vst [vmem:[#allocation2 + $0x78] sm:$0xff] %v1002_v33  ;;  %v922_v0 = vpop.xlane.xlu1 %921 }
 0x408   :  { %v1443_v38 = vpop.eup %1442  ;;  %1448 = vlog2.f32 %v922_v0 }
 0x409   :  { %v968_v6 = vmul.f32 0.6931472, %v1443_v38 }
 0x40a   :  { %v1445_v4 = vpop.eup %1444 }
 0x40b   :  { %v1003_v39 = vsub.f32 %v2014_v23, %v968_v6  ;;  %v970_v37 = vmul.f32 0.6931472, %v1445_v4 }
 0x40d   :  { %1029 = vst [vmem:[#allocation2 + $0x80] sm:$0xff] %v1003_v39  ;;  %v1004_v42 = vsub.f32 %v2018_v53, %v970_v37  ;;  %v924_v9 = vpop.xlane.xlu0 %923 }
 0x40e   :  { %1450 = vlog2.f32 %v924_v9 }
 0x40f   :  { %1030 = vst [vmem:[#allocation2 + $0x88] sm:$0xff] %v1004_v42  ;;  %v926_v13 = vpop.xlane.xlu1 %925 }
 0x410   :  { %v1447_v40 = vpop.eup %1446  ;;  %1452 = vlog2.f32 %v926_v13 }
 0x411   :  { %v972_v16 = vmul.f32 0.6931472, %v1447_v40 }
 0x412   :  { %v1449_v46 = vpop.eup %1448 }
 0x413   :  { %v1005_v49 = vsub.f32 %v2022_v31, %v972_v16  ;;  %v974_v12 = vmul.f32 0.6931472, %v1449_v46 }
 0x415   :  { %1031 = vst [vmem:[#allocation2 + $0x90] sm:$0xff] %v1005_v49  ;;  %v1006_v1 = vsub.f32 %v2026_v59, %v974_v12  ;;  %v928_v43 = vpop.xlane.xlu0 %927 }
 0x416   :  { %1454 = vlog2.f32 %v928_v43 }
 0x417   :  { %1032 = vst [vmem:[#allocation2 + $0x98] sm:$0xff] %v1006_v1  ;;  %v930_v23 = vpop.xlane.xlu1 %929 }
 0x418   :  { %v1451_v51 = vpop.eup %1450  ;;  %1456 = vlog2.f32 %v930_v23 }
 0x419   :  { %v976_v53 = vmul.f32 0.6931472, %v1451_v51 }
 0x41a   :  { %v1453_v47 = vpop.eup %1452 }
 0x41b   :  { %v1007_v48 = vsub.f32 %v2030_v62, %v976_v53  ;;  %v978_v57 = vmul.f32 0.6931472, %v1453_v47 }
 0x41d   :  { %1033 = vst [vmem:[#allocation2 + $0xa0] sm:$0xff] %v1007_v48  ;;  %v1008_v60 = vsub.f32 %v2034_v2, %v978_v57  ;;  %v932_v61 = vpop.xlane.xlu0 %931 }
 0x41e   :  { %1458 = vlog2.f32 %v932_v61 }
 0x41f   :  { %1034 = vst [vmem:[#allocation2 + $0xa8] sm:$0xff] %v1008_v60  ;;  %v934_v31 = vpop.xlane.xlu1 %933 }
 0x420   :  { %v1455_v17 = vpop.eup %1454  ;;  %1460 = vlog2.f32 %v934_v31 }
 0x421   :  { %v980_v59 = vmul.f32 0.6931472, %v1455_v17 }
 0x422   :  { %v1457_v50 = vpop.eup %1456 }
 0x423   :  { %v1009_v25 = vsub.f32 %v2038_v5, %v980_v59  ;;  %v982_v3 = vmul.f32 0.6931472, %v1457_v50 }
 0x425   :  { %1035 = vst [vmem:[#allocation2 + $0xb0] sm:$0xff] %v1009_v25  ;;  %v1010_v52 = vsub.f32 %v2042_v8, %v982_v3 }
 0x427   :  { %1036 = vst [vmem:[#allocation2 + $0xb8] sm:$0xff] %v1010_v52 }
 0x428   :  { %v1459_v62 = vpop.eup %1458 }
 0x429   :  { %v984_v7 = vmul.f32 0.6931472, %v1459_v62 }
 0x42a   :  { %v1461_v10 = vpop.eup %1460 }
 0x42b   :  { %v1011_v2 = vsub.f32 %v2046_v11, %v984_v7  ;;  %v986_v45 = vmul.f32 0.6931472, %v1461_v10 }
 0x42d   :  { %1037 = vst [vmem:[#allocation2 + $0xc0] sm:$0xff] %v1011_v2  ;;  %v1012_v29 = vsub.f32 %v2050_v14, %v986_v45 }
 0x42f   :  { %1038 = vst [vmem:[#allocation2 + $0xc8] sm:$0xff] %v1012_v29 }
 0x430   :  { %1043 = vsyncadd [#allocation3], 128  ;;  %s1488_s6 = smov [#allocation2]  }
 0x431   :  { %s1044_s15 = sshll.u32 %s1488_s6, 4  ;;  %s1045_s15 = int_to_ptr.vmem [resolvable:$true] %s1044_s15 }
 0x432   :  { %s1462_s16 = scalar_lea.vmem %s1045_s15, 3200  ;;  %s1466_s17 = scalar_lea.vmem %s1045_s15, 3328 }
 0x433   :  { %p1463_p0 = scmp.ne.s32.totalorder %s1045_s15, %s1462_s16  ;;  %p1467_p1 = scmp.lt.s32.totalorder %s1045_s15, %s1045_s15 }
 0x434   :  { %p1468_p2 = scmp.lt.s32.totalorder %s1466_s17, %s1462_s16 }
 0x436   :  { %p1469_p3 = por %p1468_p2, %p1467_p1 }
 0x438   :  { %p1470_p4 = pnand %p1469_p3, %p1463_p0 }
 0x43a   :  { %1473 = shalt.err (!%p1470_p4)
}
 0x43b   :  { %s1474_s20 = scalar_lea.hbm %s2098_s7, 3200 }
 0x43c   :  { %p1475_p5 = scmp.ne.s32.totalorder %s2098_s7, %s1474_s20  ;;  %p1478_p6 = scmp.lt.u32.totalorder %s1474_s20, %s2098_s7 }
 0x43e   :  { %p1480_p7 = pnand %p1478_p6, %p1475_p5 }
 0x440   :  { %1483 = shalt.err (!%p1480_p7)
}
 0x441   :  { %s1489_s24 = smov 128   ;;  %s1490_s25 = smov 8  }
 0x442   :  { %1050 = dma.vmem_to_hbm [thread:$0]  %s1045_s15, 3200, %s2098_s7, [#allocation3], %s1489_s24, %s1489_s24, %s1490_s25  }
 0x443   :  { %1484 = dma.done.wait [#allocation3], 3328  }
 0x444   :  { %1485 = vsyncadd [#allocation3], 4294963968 }
 0x445   :  { %1054 = vsyncpa [#allocation3], 1 }

// kernel: _mlp_forward_padded.1
= control target key start
LH: loop header
LB: loop body
LE: loop exit
PB: predicated region body
PF: predicated region fallthrough
CT: control target
= control target key end

     0   :  { %12 = vsyncpa [#allocation3], 0  ;;  %v1486_v1 = vmov 0.0   ;;  %vm1487_vm0 = vmmov 0   ;;  %vm82_vm1 = vcmask 130048   ;;  %s2091_s0 = inlined_call_operand.vmem [shape: f32[200,16], index: 0, kind: input, shape index: {}]   ;;  %s2092_s1 = inlined_call_operand.vmem [shape: bf16[16,128], index: 1, kind: input, shape index: {}]   ;;  %s2093_s2 = inlined_call_operand.vmem [shape: f32[1,128], index: 2, kind: input, shape index: {}]   ;;  %s2094_s3 = inlined_call_operand.vmem [shape: bf16[128,128], index: 3, kind: input, shape index: {}]   ;;  %s2095_s4 = inlined_call_operand.vmem [shape: f32[1,128], index: 4, kind: input, shape index: {}]   ;;  %s2096_s5 = inlined_call_operand.vmem [shape: bf16[128,128], index: 5, kind: input, shape index: {}]   ;;  %s2097_s6 = inlined_call_operand.vmem [shape: f32[1,128], index: 6, kind: input, shape index: {}]   ;;  %s2098_s7 = inlined_call_operand.hbm [shape: f32[200,128], index: 7, kind: output, shape index: {}]  }
   0x1   :  { %v1341_v0 = vld [vmem:[%s2092_s1] sm:$0xff]   ;;  %1144 = vmatprep.subr.bf16.mxu0 %v1486_v1  ;;  %v29_v3 = vld [vmem:[%s2091_s0 + $0x8] sm:$0xff]  ;;  %1334 = vmatprep.subr.bf16.mxu1 %v1486_v1  ;;  %v30_v5 = vld [vmem:[%s2091_s0 + $0x10] sm:$0xff] }
   0x2   :  { %v28_v2 = vld [vmem:[%s2091_s0] sm:$0xff]  ;;  %1145 = vmatpush3.bf16.msra.mxu0 %v1341_v0  ;;  %1146 = vmatprep.mubr.msk.bf16.mxu0 %vm1487_vm0, %v1486_v1  ;;  %v31_v6 = vld [vmem:[%s2091_s0 + $0x18] sm:$0xff]  ;;  %v42_v7 = vld [vmem:[%s2091_s0 + $0x70] sm:$0xff] }
   0x3   :  { %v54_v4 = vpack.c.bf16 %v29_v3, %v28_v2  ;;  %1335 = vmatpush3.bf16.msra.mxu1 %v1341_v0  ;;  %1174 = vmatprep.mubr.msk.bf16.mxu1 %vm1487_vm0, %v1486_v1  ;;  %v43_v8 = vld [vmem:[%s2091_s0 + $0x78] sm:$0xff]  ;;  %v55_v10 = vpack.c.bf16 %v31_v6, %v30_v5  ;;  %v44_v11 = vld [vmem:[%s2091_s0 + $0x80] sm:$0xff]  ;;  %v45_v12 = vld [vmem:[%s2091_s0 + $0x88] sm:$0xff] }
   0x4   :  { %1198 = vmatprep.subr.bf16.mxu1 %v1486_v1  ;;  %1266 = vmatprep.subr.bf16.mxu0 %v1486_v1  ;;  %v61_v9 = vpack.c.bf16 %v43_v8, %v42_v7  ;;  %v1342_v13 = vld [vmem:[%s2094_s3] sm:$0xff]   ;;  %v1343_v14 = vld [vmem:[%s2094_s3 + $0x8] sm:$0xff]   ;;  %v62_v16 = vpack.c.bf16 %v45_v12, %v44_v11  ;;  %v46_v18 = vld [vmem:[%s2091_s0 + $0x90] sm:$0xff] }
   0x5   :  { %1147 = vmatmul.mubr.msk.bf16.vlgmr.msra.gmra.mrb[0].mxu0 %vm82_vm1, %v54_v4  ;;  %v32_v15 = vld [vmem:[%s2091_s0 + $0x20] sm:$0xff]  ;;  %v33_v17 = vld [vmem:[%s2091_s0 + $0x28] sm:$0xff]  ;;  %v1344_v19 = vld [vmem:[%s2094_s3 + $0x10] sm:$0xff]  }
   0x6   :  { %1150 = vmatprep.mubr.msk.bf16.mxu0 %vm1487_vm0, %v1486_v1  ;;  %1175 = vmatmul.mubr.msk.bf16.vlgmr.msra.gmra.mrb[0].mxu1 %vm82_vm1, %v61_v9  ;;  %v56_v20 = vpack.c.bf16 %v33_v17, %v32_v15  ;;  %v47_v21 = vld [vmem:[%s2091_s0 + $0x98] sm:$0xff]  ;;  %v34_v23 = vld [vmem:[%s2091_s0 + $0x30] sm:$0xff]  ;;  %v1346_v26 = vld [vmem:[%s2094_s3 + $0x20] sm:$0xff]  }
   0x7   :  { %1178 = vmatprep.mubr.msk.bf16.mxu1 %vm1487_vm0, %v1486_v1  ;;  %1199 = vmatpush3.bf16.msra.mxu1 %v1342_v13  ;;  %v1345_v22 = vld [vmem:[%s2094_s3 + $0x18] sm:$0xff]   ;;  %v63_v25 = vpack.c.bf16 %v47_v21, %v46_v18  ;;  %v48_v28 = vld [vmem:[%s2091_s0 + $0xa0] sm:$0xff]  ;;  %v49_v29 = vld [vmem:[%s2091_s0 + $0xa8] sm:$0xff] }
   0x8   :  { %1200 = vmatprep.subr.bf16.mxu1 %v1486_v1  ;;  %v35_v24 = vld [vmem:[%s2091_s0 + $0x38] sm:$0xff]  ;;  %v1347_v30 = vld [vmem:[%s2094_s3 + $0x28] sm:$0xff]   ;;  %v64_v31 = vpack.c.bf16 %v49_v29, %v48_v28  ;;  %v36_v32 = vld [vmem:[%s2091_s0 + $0x40] sm:$0xff] }
   0x9   :  { %v57_v27 = vpack.c.bf16 %v35_v24, %v34_v23  ;;  %v37_v33 = vld [vmem:[%s2091_s0 + $0x48] sm:$0xff]  ;;  %v1348_v34 = vld [vmem:[%s2094_s3 + $0x30] sm:$0xff]   ;;  %v51_v37 = vld [vmem:[%s2091_s0 + $0xb8] sm:$0xff] }
   0xa   :  { %v58_v35 = vpack.c.bf16 %v37_v33, %v36_v32  ;;  %v50_v36 = vld [vmem:[%s2091_s0 + $0xb0] sm:$0xff]  ;;  %v39_v40 = vld [vmem:[%s2091_s0 + $0x58] sm:$0xff]  ;;  %v52_v42 = vld [vmem:[%s2091_s0 + $0xc0] sm:$0xff] }
   0xb   :  { %1201 = vmatpush3.bf16.msra.mxu1 %v1343_v14  ;;  %v65_v38 = vpack.c.bf16 %v51_v37, %v50_v36  ;;  %v38_v39 = vld [vmem:[%s2091_s0 + $0x50] sm:$0xff]  ;;  %v53_v43 = vld [vmem:[%s2091_s0 + $0xc8] sm:$0xff]  ;;  %v40_v45 = vld [vmem:[%s2091_s0 + $0x60] sm:$0xff] }
   0xc   :  { %1202 = vmatprep.subr.bf16.mxu1 %v1486_v1  ;;  %v59_v41 = vpack.c.bf16 %v39_v40, %v38_v39  ;;  %v66_v44 = vpack.c.bf16 %v53_v43, %v52_v42  ;;  %v41_v46 = vld [vmem:[%s2091_s0 + $0x68] sm:$0xff]  ;;  %v1349_v48 = vld [vmem:[%s2094_s3 + $0x38] sm:$0xff]   ;;  %v1350_v49 = vld [vmem:[%s2096_s5] sm:$0xff]  }
   0xd   :  { %1151 = vmatmul.mubr.msk.bf16.gmra.mrb[4].mxu0 %vm82_vm1, %v55_v10  ;;  %v60_v47 = vpack.c.bf16 %v41_v46, %v40_v45  ;;  %v1351_v50 = vld [vmem:[%s2096_s5 + $0x8] sm:$0xff]   ;;  %v1352_v51 = vld [vmem:[%s2096_s5 + $0x10] sm:$0xff]   ;;  %v1353_v52 = vld [vmem:[%s2096_s5 + $0x18] sm:$0xff]  }
   0xe   :  { %1154 = vmatprep.mubr.msk.bf16.mxu0 %vm1487_vm0, %v1486_v1  ;;  %1179 = vmatmul.mubr.msk.bf16.gmra.mrb[4].mxu1 %vm82_vm1, %v62_v16  ;;  %v1354_v53 = vld [vmem:[%s2096_s5 + $0x20] sm:$0xff]   ;;  %v1355_v54 = vld [vmem:[%s2096_s5 + $0x28] sm:$0xff]   ;;  %v1356_v56 = vld [vmem:[%s2096_s5 + $0x30] sm:$0xff]  }
   0xf   :  { %1182 = vmatprep.mubr.msk.bf16.mxu1 %vm1487_vm0, %v1486_v1  ;;  %1203 = vmatpush3.bf16.msra.mxu1 %v1344_v19  ;;  %v1716_v55 = vld [vmem:[%s2093_s2] ss:$0 sm:$0xff] }
  0x10   :  { %1204 = vmatprep.subr.bf16.mxu1 %v1486_v1  ;;  %1267 = vmatpush3.bf16.msra.mxu0 %v1350_v49 }
  0x11   :  { %1268 = vmatprep.subr.bf16.mxu0 %v1486_v1 }
  0x13   :  { %1205 = vmatpush3.bf16.msra.mxu1 %v1345_v22 }
  0x14   :  { %1206 = vmatprep.subr.bf16.mxu1 %v1486_v1  ;;  %1269 = vmatpush3.bf16.msra.mxu0 %v1351_v50 }
  0x15   :  { %1155 = vmatmul.mubr.msk.bf16.gmra.mrb[8].mxu0 %vm82_vm1, %v56_v20  ;;  %1270 = vmatprep.subr.bf16.mxu0 %v1486_v1 }
  0x16   :  { %1158 = vmatprep.mubr.msk.bf16.mxu0 %vm1487_vm0, %v1486_v1  ;;  %1183 = vmatmul.mubr.msk.bf16.gmra.mrb[8].mxu1 %vm82_vm1, %v63_v25 }
  0x17   :  { %1186 = vmatprep.mubr.msk.bf16.mxu1 %vm1487_vm0, %v1486_v1  ;;  %1207 = vmatpush3.bf16.msra.mxu1 %v1346_v26 }
  0x18   :  { %1208 = vmatprep.subr.bf16.mxu1 %v1486_v1  ;;  %1271 = vmatpush3.bf16.msra.mxu0 %v1352_v51 }
  0x19   :  { %1272 = vmatprep.subr.bf16.mxu0 %v1486_v1 }
  0x1b   :  { %1209 = vmatpush3.bf16.msra.mxu1 %v1347_v30 }
  0x1c   :  { %1210 = vmatprep.subr.bf16.mxu1 %v1486_v1  ;;  %1273 = vmatpush3.bf16.msra.mxu0 %v1353_v52 }
  0x1d   :  { %1159 = vmatmul.mubr.msk.bf16.gmra.mrb[12].mxu0 %vm82_vm1, %v57_v27  ;;  %1274 = vmatprep.subr.bf16.mxu0 %v1486_v1 }
  0x1e   :  { %1162 = vmatprep.mubr.msk.bf16.mxu0 %vm1487_vm0, %v1486_v1  ;;  %1187 = vmatmul.mubr.msk.bf16.gmra.mrb[12].mxu1 %vm82_vm1, %v64_v31 }
  0x1f   :  { %1190 = vmatprep.mubr.msk.bf16.mxu1 %vm1487_vm0, %v1486_v1  ;;  %1211 = vmatpush3.bf16.msra.mxu1 %v1348_v34 }
  0x20   :  { %1212 = vmatprep.subr.bf16.mxu1 %v1486_v1  ;;  %1275 = vmatpush3.bf16.msra.mxu0 %v1354_v53 }
  0x21   :  { %1276 = vmatprep.subr.bf16.mxu0 %v1486_v1 }
  0x23   :  { %1213 = vmatpush3.bf16.msra.mxu1 %v1349_v48 }
  0x24   :  { %1277 = vmatpush3.bf16.msra.mxu0 %v1355_v54 }
  0x25   :  { %1163 = vmatmul.mubr.msk.bf16.gmra.mrb[16].mxu0 %vm82_vm1, %v58_v35  ;;  %1278 = vmatprep.subr.bf16.mxu0 %v1486_v1 }
  0x26   :  { %1166 = vmatprep.mubr.msk.bf16.mxu0 %vm1487_vm0, %v1486_v1  ;;  %1191 = vmatmul.mubr.msk.bf16.gmra.mrb[16].mxu1 %vm82_vm1, %v65_v38 }
  0x27   :  { %1194 = vmatprep.mubr.msk.bf16.mxu1 %vm1487_vm0, %v1486_v1 }
  0x28   :  { %1279 = vmatpush3.bf16.msra.mxu0 %v1356_v56 }
  0x29   :  { %1280 = vmatprep.subr.bf16.mxu0 %v1486_v1 }
  0x2d   :  { %1167 = vmatmul.mubr.msk.bf16.gmra.mrb[20].mxu0 %vm82_vm1, %v59_v41 }
  0x2e   :  { %1170 = vmatprep.mubr.msk.bf16.mxu0 %vm1487_vm0, %v1486_v1  ;;  %1195 = vmatmul.mubr.msk.bf16.gmra.mrb[20].mxu1 %vm82_vm1, %v66_v44 }
  0x2f   :  { %1214 = vmatprep.mubr.msk.bf16.mxu1 %vm1487_vm0, %v1486_v1 }
  0x35   :  { %1171 = vmatmul.mubr.msk.bf16.gmra.mrb[24].mxu0 %vm82_vm1, %v60_v47 }
  0x36   :  { %1282 = vmatprep.mubr.msk.bf16.mxu0 %vm1487_vm0, %v1486_v1 }
  0xd8   :  { %v156_v57 = vpop.f32.mrb[0].mxu0 }
  0xd9   :  { %v157_v58 = vadd.f32 %v1716_v55, %v156_v57  ;;  %v1148_v59 = vpop.f32.mrb[1].mxu0  ;;  %v212_v63 = vpop.f32.mrb[0].mxu1 }
  0xda   :  { %v159_v60 = vpop.f32.mrb[2].mxu0  ;;  %v213_v3 = vadd.f32 %v1716_v55, %v212_v63  ;;  %v1176_v4 = vpop.f32.mrb[1].mxu1 }
  0xdb   :  { %v160_v61 = vadd.f32 %v1716_v55, %v159_v60  ;;  %v1149_v62 = vpop.f32.mrb[3].mxu0  ;;  %v259_v0 = vmax.f32 %v157_v58, 0.0  ;;  %v215_v5 = vpop.f32.mrb[2].mxu1 }
  0xdc   :  { %v273_v7 = vmax.f32 %v213_v3, 0.0  ;;  %v216_v8 = vadd.f32 %v1716_v55, %v215_v5  ;;  %v1177_v9 = vpop.f32.mrb[3].mxu1 }
  0xdd   :  { %v260_v2 = vmax.f32 %v160_v61, 0.0 }
  0xde   :  { %v274_v13 = vmax.f32 %v216_v8, 0.0 }
  0xdf   :  { %v285_v6 = vpack.c.bf16 %v260_v2, %v259_v0 }
  0xe0   :  { %v164_v10 = vpop.f32.mrb[4].mxu0  ;;  %v1731_v17 = vpack.c.bf16 %v274_v13, %v273_v7 }
  0xe1   :  { %v165_v11 = vadd.f32 %v1716_v55, %v164_v10  ;;  %v1152_v12 = vpop.f32.mrb[5].mxu0  ;;  %1215 = vmatmul.mubr.bf16.vlgmr.msra.gmra.mrb[24].mxu1 %v285_v6  ;;  %v220_v18 = vpop.f32.mrb[4].mxu1 }
  0xe2   :  { %v167_v14 = vpop.f32.mrb[6].mxu0  ;;  %1218 = vmatprep.mubr.msk.bf16.mxu1 %vm1487_vm0, %v1486_v1  ;;  %v221_v21 = vadd.f32 %v1716_v55, %v220_v18  ;;  %v1180_v22 = vpop.f32.mrb[5].mxu1 }
  0xe3   :  { %v168_v15 = vadd.f32 %v1716_v55, %v167_v14  ;;  %v1153_v16 = vpop.f32.mrb[7].mxu0  ;;  %v261_v19 = vmax.f32 %v165_v11, 0.0  ;;  %v223_v23 = vpop.f32.mrb[6].mxu1 }
  0xe4   :  { %v275_v25 = vmax.f32 %v221_v21, 0.0  ;;  %v224_v26 = vadd.f32 %v1716_v55, %v223_v23  ;;  %v1181_v27 = vpop.f32.mrb[7].mxu1 }
  0xe5   :  { %v262_v20 = vmax.f32 %v168_v15, 0.0 }
  0xe6   :  { %v276_v31 = vmax.f32 %v224_v26, 0.0 }
  0xe7   :  { %v286_v24 = vpack.c.bf16 %v262_v20, %v261_v19 }
  0xe8   :  { %v172_v28 = vpop.f32.mrb[8].mxu0  ;;  %v1739_v35 = vpack.c.bf16 %v276_v31, %v275_v25 }
  0xe9   :  { %v173_v29 = vadd.f32 %v1716_v55, %v172_v28  ;;  %v1156_v30 = vpop.f32.mrb[9].mxu0  ;;  %1219 = vmatmul.mubr.bf16.gmra.mrb[28].mxu1 %v286_v24  ;;  %v228_v36 = vpop.f32.mrb[8].mxu1 }
  0xea   :  { %v175_v32 = vpop.f32.mrb[10].mxu0  ;;  %1222 = vmatprep.mubr.msk.bf16.mxu1 %vm1487_vm0, %v1486_v1  ;;  %v229_v39 = vadd.f32 %v1716_v55, %v228_v36  ;;  %v1184_v40 = vpop.f32.mrb[9].mxu1 }
  0xeb   :  { %v176_v33 = vadd.f32 %v1716_v55, %v175_v32  ;;  %v1157_v34 = vpop.f32.mrb[11].mxu0  ;;  %v263_v37 = vmax.f32 %v173_v29, 0.0  ;;  %v231_v41 = vpop.f32.mrb[10].mxu1 }
  0xec   :  { %v277_v43 = vmax.f32 %v229_v39, 0.0  ;;  %v232_v44 = vadd.f32 %v1716_v55, %v231_v41  ;;  %v1185_v45 = vpop.f32.mrb[11].mxu1 }
  0xed   :  { %v264_v38 = vmax.f32 %v176_v33, 0.0 }
  0xee   :  { %v278_v49 = vmax.f32 %v232_v44, 0.0 }
  0xef   :  { %v287_v42 = vpack.c.bf16 %v264_v38, %v263_v37 }
  0xf0   :  { %v180_v46 = vpop.f32.mrb[12].mxu0  ;;  %v1747_v53 = vpack.c.bf16 %v278_v49, %v277_v43 }
  0xf1   :  { %v181_v47 = vadd.f32 %v1716_v55, %v180_v46  ;;  %v1160_v48 = vpop.f32.mrb[13].mxu0  ;;  %1223 = vmatmul.mubr.bf16.gmra.mrb[32].mxu1 %v287_v42  ;;  %v236_v54 = vpop.f32.mrb[12].mxu1 }
  0xf2   :  { %v183_v50 = vpop.f32.mrb[14].mxu0  ;;  %1226 = vmatprep.mubr.msk.bf16.mxu1 %vm1487_vm0, %v1486_v1  ;;  %v237_v58 = vadd.f32 %v1716_v55, %v236_v54  ;;  %v1188_v59 = vpop.f32.mrb[13].mxu1 }
  0xf3   :  { %v184_v51 = vadd.f32 %v1716_v55, %v183_v50  ;;  %v1161_v52 = vpop.f32.mrb[15].mxu0  ;;  %v265_v56 = vmax.f32 %v181_v47, 0.0  ;;  %v239_v60 = vpop.f32.mrb[14].mxu1 }
  0xf4   :  { %v279_v62 = vmax.f32 %v237_v58, 0.0  ;;  %v240_v63 = vadd.f32 %v1716_v55, %v239_v60  ;;  %v1189_v0 = vpop.f32.mrb[15].mxu1 }
  0xf5   :  { %v266_v57 = vmax.f32 %v184_v51, 0.0 }
  0xf6   :  { %v280_v5 = vmax.f32 %v240_v63, 0.0 }
  0xf7   :  { %v288_v61 = vpack.c.bf16 %v266_v57, %v265_v56 }
  0xf8   :  { %v188_v2 = vpop.f32.mrb[16].mxu0  ;;  %v295_v9 = vpack.c.bf16 %v280_v5, %v279_v62 }
  0xf9   :  { %v189_v3 = vadd.f32 %v1716_v55, %v188_v2  ;;  %v1164_v4 = vpop.f32.mrb[17].mxu0  ;;  %1227 = vmatmul.mubr.bf16.gmra.mrb[36].mxu1 %v288_v61  ;;  %v244_v10 = vpop.f32.mrb[16].mxu1 }
  0xfa   :  { %v191_v6 = vpop.f32.mrb[18].mxu0  ;;  %1230 = vmatprep.mubr.msk.bf16.mxu1 %vm1487_vm0, %v1486_v1  ;;  %v245_v13 = vadd.f32 %v1716_v55, %v244_v10  ;;  %v1192_v14 = vpop.f32.mrb[17].mxu1 }
  0xfb   :  { %v192_v7 = vadd.f32 %v1716_v55, %v191_v6  ;;  %v1165_v8 = vpop.f32.mrb[19].mxu0  ;;  %v267_v11 = vmax.f32 %v189_v3, 0.0  ;;  %v247_v15 = vpop.f32.mrb[18].mxu1 }
  0xfc   :  { %v281_v18 = vmax.f32 %v245_v13, 0.0  ;;  %v248_v19 = vadd.f32 %v1716_v55, %v247_v15  ;;  %v1193_v20 = vpop.f32.mrb[19].mxu1 }
  0xfd   :  { %v268_v12 = vmax.f32 %v192_v7, 0.0 }
  0xfe   :  { %v282_v24 = vmax.f32 %v248_v19, 0.0 }
  0xff   :  { %v289_v16 = vpack.c.bf16 %v268_v12, %v267_v11 }
 0x100   :  { %v196_v21 = vpop.f32.mrb[20].mxu0  ;;  %v296_v28 = vpack.c.bf16 %v282_v24, %v281_v18 }
 0x101   :  { %v197_v22 = vadd.f32 %v1716_v55, %v196_v21  ;;  %v1168_v23 = vpop.f32.mrb[21].mxu0  ;;  %1231 = vmatmul.mubr.bf16.gmra.mrb[40].mxu1 %v289_v16  ;;  %v252_v29 = vpop.f32.mrb[20].mxu1 }
 0x102   :  { %v199_v25 = vpop.f32.mrb[22].mxu0  ;;  %1234 = vmatprep.mubr.msk.bf16.mxu1 %vm1487_vm0, %v1486_v1  ;;  %v253_v32 = vadd.f32 %v1716_v55, %v252_v29  ;;  %v1196_v33 = vpop.f32.mrb[21].mxu1 }
 0x103   :  { %v200_v26 = vadd.f32 %v1716_v55, %v199_v25  ;;  %v1169_v27 = vpop.f32.mrb[23].mxu0  ;;  %v269_v30 = vmax.f32 %v197_v22, 0.0  ;;  %v255_v34 = vpop.f32.mrb[22].mxu1 }
 0x104   :  { %v283_v37 = vmax.f32 %v253_v32, 0.0  ;;  %v256_v38 = vadd.f32 %v1716_v55, %v255_v34  ;;  %v1197_v39 = vpop.f32.mrb[23].mxu1 }
 0x105   :  { %v270_v31 = vmax.f32 %v200_v26, 0.0 }
 0x106   :  { %v284_v43 = vmax.f32 %v256_v38, 0.0 }
 0x107   :  { %v290_v36 = vpack.c.bf16 %v270_v31, %v269_v30 }
 0x108   :  { %v204_v40 = vpop.f32.mrb[24].mxu0  ;;  %v297_v47 = vpack.c.bf16 %v284_v43, %v283_v37 }
 0x109   :  { %v205_v41 = vadd.f32 %v1716_v55, %v204_v40  ;;  %v1172_v42 = vpop.f32.mrb[25].mxu0  ;;  %1235 = vmatmul.mubr.bf16.gmra.mrb[44].mxu1 %v290_v36 }
 0x10a   :  { %v207_v44 = vpop.f32.mrb[26].mxu0  ;;  %1238 = vmatprep.mubr.msk.bf16.mxu1 %vm1487_vm0, %v1486_v1 }
 0x10b   :  { %v208_v45 = vadd.f32 %v1716_v55, %v207_v44  ;;  %v1173_v46 = vpop.f32.mrb[27].mxu0  ;;  %v271_v48 = vmax.f32 %v205_v41, 0.0  ;;  %v1357_v55 = vld [vmem:[%s2096_s5 + $0x38] sm:$0xff]  }
 0x10c   :  { %1281 = vmatpush3.bf16.msra.mxu0 %v1357_v55 }
 0x10d   :  { %v272_v49 = vmax.f32 %v208_v45, 0.0 }
 0x10f   :  { %v291_v50 = vpack.c.bf16 %v272_v49, %v271_v48 }
 0x111   :  { %1239 = vmatmul.mubr.bf16.gmra.mrb[48].mxu1 %v291_v50 }
 0x112   :  { %1242 = vmatprep.mubr.msk.bf16.mxu1 %vm1487_vm0, %v1486_v1 }
 0x119   :  { %1243 = vmatmul.mubr.bf16.gmra.mrb[52].mxu1 %v1731_v17  ;;  %v1788_v17 = vld [vmem:[%s2095_s4] ss:$0 sm:$0xff] }
 0x11a   :  { %1246 = vmatprep.mubr.msk.bf16.mxu1 %vm1487_vm0, %v1486_v1 }
 0x121   :  { %1247 = vmatmul.mubr.bf16.gmra.mrb[56].mxu1 %v1739_v35 }
 0x122   :  { %1250 = vmatprep.mubr.msk.bf16.mxu1 %vm1487_vm0, %v1486_v1 }
 0x129   :  { %1251 = vmatmul.mubr.bf16.gmra.mrb[60].mxu1 %v1747_v53 }
 0x12a   :  { %1254 = vmatprep.mubr.msk.bf16.mxu1 %vm1487_vm0, %v1486_v1 }
 0x131   :  { %1255 = vmatmul.mubr.bf16.gmra.mrb[64].mxu1 %v295_v9 }
 0x132   :  { %1258 = vmatprep.mubr.msk.bf16.mxu1 %vm1487_vm0, %v1486_v1 }
 0x139   :  { %1259 = vmatmul.mubr.bf16.gmra.mrb[68].mxu1 %v296_v28 }
 0x13a   :  { %1262 = vmatprep.mubr.msk.bf16.mxu1 %vm1487_vm0, %v1486_v1 }
 0x141   :  { %1263 = vmatmul.mubr.bf16.gmra.mrb[72].mxu1 %v297_v47 }
 0x1b4   :  { %v403_v35 = vpop.f32.mrb[24].mxu1 }
 0x1b5   :  { %v404_v51 = vadd.f32 %v1788_v17, %v403_v35  ;;  %v1216_v52 = vpop.f32.mrb[25].mxu1 }
 0x1b6   :  { %v406_v53 = vpop.f32.mrb[26].mxu1 }
 0x1b7   :  { %v407_v54 = vadd.f32 %v1788_v17, %v406_v53  ;;  %v1217_v56 = vpop.f32.mrb[27].mxu1  ;;  %v506_v57 = vmax.f32 %v404_v51, 0.0 }
 0x1b9   :  { %v507_v58 = vmax.f32 %v407_v54, 0.0 }
 0x1bb   :  { %v532_v59 = vpack.c.bf16 %v507_v58, %v506_v57 }
 0x1bc   :  { %v411_v60 = vpop.f32.mrb[28].mxu1 }
 0x1bd   :  { %v412_v61 = vadd.f32 %v1788_v17, %v411_v60  ;;  %v1220_v62 = vpop.f32.mrb[29].mxu1  ;;  %1283 = vmatmul.mubr.bf16.vlgmr.msra.gmra.mrb[28].mxu0 %v532_v59 }
 0x1be   :  { %v414_v63 = vpop.f32.mrb[30].mxu1  ;;  %1286 = vmatprep.mubr.msk.bf16.mxu0 %vm1487_vm0, %v1486_v1 }
 0x1bf   :  { %v415_v0 = vadd.f32 %v1788_v17, %v414_v63  ;;  %v1221_v2 = vpop.f32.mrb[31].mxu1  ;;  %v508_v3 = vmax.f32 %v412_v61, 0.0 }
 0x1c1   :  { %v509_v4 = vmax.f32 %v415_v0, 0.0 }
 0x1c3   :  { %v533_v5 = vpack.c.bf16 %v509_v4, %v508_v3 }
 0x1c4   :  { %v419_v6 = vpop.f32.mrb[32].mxu1 }
 0x1c5   :  { %v420_v7 = vadd.f32 %v1788_v17, %v419_v6  ;;  %v1224_v8 = vpop.f32.mrb[33].mxu1  ;;  %1287 = vmatmul.mubr.bf16.gmra.mrb[32].mxu0 %v533_v5 }
 0x1c6   :  { %v422_v9 = vpop.f32.mrb[34].mxu1  ;;  %1290 = vmatprep.mubr.msk.bf16.mxu0 %vm1487_vm0, %v1486_v1 }
 0x1c7   :  { %v423_v10 = vadd.f32 %v1788_v17, %v422_v9  ;;  %v1225_v11 = vpop.f32.mrb[35].mxu1  ;;  %v510_v12 = vmax.f32 %v420_v7, 0.0 }
 0x1c9   :  { %v511_v13 = vmax.f32 %v423_v10, 0.0 }
 0x1cb   :  { %v534_v14 = vpack.c.bf16 %v511_v13, %v510_v12 }
 0x1cc   :  { %v427_v15 = vpop.f32.mrb[36].mxu1 }
 0x1cd   :  { %v428_v16 = vadd.f32 %v1788_v17, %v427_v15  ;;  %v1228_v18 = vpop.f32.mrb[37].mxu1  ;;  %1291 = vmatmul.mubr.bf16.gmra.mrb[36].mxu0 %v534_v14 }
 0x1ce   :  { %v430_v19 = vpop.f32.mrb[38].mxu1  ;;  %1294 = vmatprep.mubr.msk.bf16.mxu0 %vm1487_vm0, %v1486_v1 }
 0x1cf   :  { %v431_v20 = vadd.f32 %v1788_v17, %v430_v19  ;;  %v1229_v21 = vpop.f32.mrb[39].mxu1  ;;  %v512_v22 = vmax.f32 %v428_v16, 0.0 }
 0x1d1   :  { %v513_v23 = vmax.f32 %v431_v20, 0.0 }
 0x1d3   :  { %v535_v24 = vpack.c.bf16 %v513_v23, %v512_v22 }
 0x1d4   :  { %v435_v25 = vpop.f32.mrb[40].mxu1 }
 0x1d5   :  { %v436_v26 = vadd.f32 %v1788_v17, %v435_v25  ;;  %v1232_v27 = vpop.f32.mrb[41].mxu1  ;;  %1295 = vmatmul.mubr.bf16.gmra.mrb[40].mxu0 %v535_v24 }
 0x1d6   :  { %v438_v28 = vpop.f32.mrb[42].mxu1  ;;  %1298 = vmatprep.mubr.msk.bf16.mxu0 %vm1487_vm0, %v1486_v1 }
 0x1d7   :  { %v439_v29 = vadd.f32 %v1788_v17, %v438_v28  ;;  %v1233_v30 = vpop.f32.mrb[43].mxu1  ;;  %v514_v31 = vmax.f32 %v436_v26, 0.0 }
 0x1d9   :  { %v515_v32 = vmax.f32 %v439_v29, 0.0 }
 0x1db   :  { %v536_v33 = vpack.c.bf16 %v515_v32, %v514_v31 }
 0x1dc   :  { %v443_v34 = vpop.f32.mrb[44].mxu1 }
 0x1dd   :  { %v444_v36 = vadd.f32 %v1788_v17, %v443_v34  ;;  %v1236_v37 = vpop.f32.mrb[45].mxu1  ;;  %1299 = vmatmul.mubr.bf16.gmra.mrb[44].mxu0 %v536_v33 }
 0x1de   :  { %v446_v38 = vpop.f32.mrb[46].mxu1  ;;  %1302 = vmatprep.mubr.msk.bf16.mxu0 %vm1487_vm0, %v1486_v1 }
 0x1df   :  { %v447_v39 = vadd.f32 %v1788_v17, %v446_v38  ;;  %v1237_v40 = vpop.f32.mrb[47].mxu1  ;;  %v516_v41 = vmax.f32 %v444_v36, 0.0 }
 0x1e1   :  { %v517_v42 = vmax.f32 %v447_v39, 0.0 }
 0x1e3   :  { %v537_v43 = vpack.c.bf16 %v517_v42, %v516_v41 }
 0x1e4   :  { %v451_v44 = vpop.f32.mrb[48].mxu1 }
 0x1e5   :  { %v452_v45 = vadd.f32 %v1788_v17, %v451_v44  ;;  %v1240_v46 = vpop.f32.mrb[49].mxu1  ;;  %1303 = vmatmul.mubr.bf16.gmra.mrb[48].mxu0 %v537_v43 }
 0x1e6   :  { %v454_v47 = vpop.f32.mrb[50].mxu1  ;;  %1306 = vmatprep.mubr.msk.bf16.mxu0 %vm1487_vm0, %v1486_v1 }
 0x1e7   :  { %v455_v48 = vadd.f32 %v1788_v17, %v454_v47  ;;  %v1241_v49 = vpop.f32.mrb[51].mxu1  ;;  %v518_v50 = vmax.f32 %v452_v45, 0.0  ;;  %v1843_v45 = vld [vmem:[%s2097_s6] ss:$0 sm:$0xff] }
 0x1e9   :  { %v519_v55 = vmax.f32 %v455_v48, 0.0 }
 0x1eb   :  { %v538_v35 = vpack.c.bf16 %v519_v55, %v518_v50 }
 0x1ec   :  { %v459_v51 = vpop.f32.mrb[52].mxu1 }
 0x1ed   :  { %v460_v52 = vadd.f32 %v1788_v17, %v459_v51  ;;  %v1244_v53 = vpop.f32.mrb[53].mxu1  ;;  %1307 = vmatmul.mubr.bf16.gmra.mrb[52].mxu0 %v538_v35 }
 0x1ee   :  { %v462_v54 = vpop.f32.mrb[54].mxu1  ;;  %1310 = vmatprep.mubr.msk.bf16.mxu0 %vm1487_vm0, %v1486_v1 }
 0x1ef   :  { %v463_v56 = vadd.f32 %v1788_v17, %v462_v54  ;;  %v1245_v57 = vpop.f32.mrb[55].mxu1  ;;  %v520_v58 = vmax.f32 %v460_v52, 0.0 }
 0x1f1   :  { %v521_v59 = vmax.f32 %v463_v56, 0.0 }
 0x1f3   :  { %v539_v60 = vpack.c.bf16 %v521_v59, %v520_v58 }
 0x1f4   :  { %v467_v61 = vpop.f32.mrb[56].mxu1 }
 0x1f5   :  { %v468_v62 = vadd.f32 %v1788_v17, %v467_v61  ;;  %v1248_v63 = vpop.f32.mrb[57].mxu1  ;;  %1311 = vmatmul.mubr.bf16.gmra.mrb[56].mxu0 %v539_v60 }
 0x1f6   :  { %v470_v0 = vpop.f32.mrb[58].mxu1  ;;  %1314 = vmatprep.mubr.msk.bf16.mxu0 %vm1487_vm0, %v1486_v1 }
 0x1f7   :  { %v471_v2 = vadd.f32 %v1788_v17, %v470_v0  ;;  %v1249_v3 = vpop.f32.mrb[59].mxu1  ;;  %v522_v4 = vmax.f32 %v468_v62, 0.0 }
 0x1f9   :  { %v523_v5 = vmax.f32 %v471_v2, 0.0 }
 0x1fb   :  { %v540_v6 = vpack.c.bf16 %v523_v5, %v522_v4 }
 0x1fc   :  { %v475_v7 = vpop.f32.mrb[60].mxu1 }
 0x1fd   :  { %v476_v8 = vadd.f32 %v1788_v17, %v475_v7  ;;  %v1252_v9 = vpop.f32.mrb[61].mxu1  ;;  %1315 = vmatmul.mubr.bf16.gmra.mrb[60].mxu0 %v540_v6 }
 0x1fe   :  { %v478_v10 = vpop.f32.mrb[62].mxu1  ;;  %1318 = vmatprep.mubr.msk.bf16.mxu0 %vm1487_vm0, %v1486_v1 }
 0x1ff   :  { %v479_v11 = vadd.f32 %v1788_v17, %v478_v10  ;;  %v1253_v12 = vpop.f32.mrb[63].mxu1  ;;  %v524_v13 = vmax.f32 %v476_v8, 0.0 }
 0x201   :  { %v525_v14 = vmax.f32 %v479_v11, 0.0 }
 0x203   :  { %v541_v15 = vpack.c.bf16 %v525_v14, %v524_v13 }
 0x204   :  { %v483_v16 = vpop.f32.mrb[64].mxu1 }
 0x205   :  { %v484_v18 = vadd.f32 %v1788_v17, %v483_v16  ;;  %v1256_v19 = vpop.f32.mrb[65].mxu1  ;;  %1319 = vmatmul.mubr.bf16.gmra.mrb[64].mxu0 %v541_v15 }
 0x206   :  { %v486_v20 = vpop.f32.mrb[66].mxu1  ;;  %1322 = vmatprep.mubr.msk.bf16.mxu0 %vm1487_vm0, %v1486_v1 }
 0x207   :  { %v487_v21 = vadd.f32 %v1788_v17, %v486_v20  ;;  %v1257_v22 = vpop.f32.mrb[67].mxu1  ;;  %v526_v23 = vmax.f32 %v484_v18, 0.0 }
 0x209   :  { %v527_v24 = vmax.f32 %v487_v21, 0.0 }
 0x20b   :  { %v542_v25 = vpack.c.bf16 %v527_v24, %v526_v23 }
 0x20c   :  { %v491_v26 = vpop.f32.mrb[68].mxu1 }
 0x20d   :  { %v492_v27 = vadd.f32 %v1788_v17, %v491_v26  ;;  %v1260_v28 = vpop.f32.mrb[69].mxu1  ;;  %1323 = vmatmul.mubr.bf16.gmra.mrb[68].mxu0 %v542_v25 }
 0x20e   :  { %v494_v29 = vpop.f32.mrb[70].mxu1  ;;  %1326 = vmatprep.mubr.msk.bf16.mxu0 %vm1487_vm0, %v1486_v1 }
 0x20f   :  { %v495_v30 = vadd.f32 %v1788_v17, %v494_v29  ;;  %v1261_v31 = vpop.f32.mrb[71].mxu1  ;;  %v528_v32 = vmax.f32 %v492_v27, 0.0 }
 0x211   :  { %v529_v33 = vmax.f32 %v495_v30, 0.0 }
 0x213   :  { %v543_v34 = vpack.c.bf16 %v529_v33, %v528_v32 }
 0x214   :  { %v499_v36 = vpop.f32.mrb[72].mxu1 }
 0x215   :  { %v500_v37 = vadd.f32 %v1788_v17, %v499_v36  ;;  %v1264_v38 = vpop.f32.mrb[73].mxu1  ;;  %1327 = vmatmul.mubr.bf16.gmra.mrb[72].mxu0 %v543_v34 }
 0x216   :  { %v502_v39 = vpop.f32.mrb[74].mxu1  ;;  %1330 = vmatprep.mubr.msk.bf16.mxu0 %vm1487_vm0, %v1486_v1 }
 0x217   :  { %v503_v40 = vadd.f32 %v1788_v17, %v502_v39  ;;  %v1265_v41 = vpop.f32.mrb[75].mxu1  ;;  %v530_v42 = vmax.f32 %v500_v37, 0.0 }
 0x219   :  { %v531_v43 = vmax.f32 %v503_v40, 0.0 }
 0x21b   :  { %v544_v44 = vpack.c.bf16 %v531_v43, %v530_v42 }
 0x21d   :  { %1331 = vmatmul.mubr.bf16.gmra.mrb[76].mxu0 %v544_v44 }
 0x290   :  { %v650_v46 = vpop.f32.mrb[28].mxu0 }
 0x291   :  { %v1846_v47 = vadd.f32 %v1843_v45, %v650_v46  ;;  %v1284_v48 = vpop.f32.mrb[29].mxu0 }
 0x292   :  { %v653_v49 = vpop.f32.mrb[30].mxu0 }
 0x293   :  { %753 = vmax.xlane.f32.xlu0 %v1846_v47  ;;  %v1285_v1 = vpop.f32.mrb[31].mxu0  ;;  %v1850_v17 = vadd.f32 %v1843_v45, %v653_v49 }
 0x297   :  { %755 = vmax.xlane.f32.xlu0 %v1850_v17 }
 0x298   :  { %v658_v50 = vpop.f32.mrb[32].mxu0 }
 0x299   :  { %v1854_v55 = vadd.f32 %v1843_v45, %v658_v50  ;;  %v1288_v35 = vpop.f32.mrb[33].mxu0 }
 0x29a   :  { %v661_v51 = vpop.f32.mrb[34].mxu0 }
 0x29b   :  { %757 = vmax.xlane.f32.xlu1 %v1854_v55  ;;  %v1289_v52 = vpop.f32.mrb[35].mxu0  ;;  %v1858_v53 = vadd.f32 %v1843_v45, %v661_v51 }
 0x29f   :  { %759 = vmax.xlane.f32.xlu1 %v1858_v53 }
 0x2a0   :  { %v666_v54 = vpop.f32.mrb[36].mxu0 }
 0x2a1   :  { %v1862_v56 = vadd.f32 %v1843_v45, %v666_v54  ;;  %v1292_v57 = vpop.f32.mrb[37].mxu0 }
 0x2a2   :  { %v669_v58 = vpop.f32.mrb[38].mxu0 }
 0x2a3   :  { %v1865_v59 = vadd.f32 %v1843_v45, %v669_v58  ;;  %761 = vmax.xlane.f32.xlu0 %v1862_v56  ;;  %v1293_v60 = vpop.f32.mrb[39].mxu0 }
 0x2a5   :  { %763 = vmax.xlane.f32.xlu1 %v1865_v59 }
 0x2a8   :  { %v674_v61 = vpop.f32.mrb[40].mxu0 }
 0x2a9   :  { %v1870_v62 = vadd.f32 %v1843_v45, %v674_v61  ;;  %v1296_v63 = vpop.f32.mrb[41].mxu0 }
 0x2aa   :  { %v677_v0 = vpop.f32.mrb[42].mxu0 }
 0x2ab   :  { %v1873_v2 = vadd.f32 %v1843_v45, %v677_v0  ;;  %765 = vmax.xlane.f32.xlu0 %v1870_v62  ;;  %v1297_v3 = vpop.f32.mrb[43].mxu0 }
 0x2ad   :  { %767 = vmax.xlane.f32.xlu1 %v1873_v2 }
 0x2b0   :  { %v682_v4 = vpop.f32.mrb[44].mxu0 }
 0x2b1   :  { %v1878_v5 = vadd.f32 %v1843_v45, %v682_v4  ;;  %v1300_v6 = vpop.f32.mrb[45].mxu0 }
 0x2b2   :  { %v685_v7 = vpop.f32.mrb[46].mxu0 }
 0x2b3   :  { %v1881_v8 = vadd.f32 %v1843_v45, %v685_v7  ;;  %769 = vmax.xlane.f32.xlu0 %v1878_v5  ;;  %v1301_v9 = vpop.f32.mrb[47].mxu0 }
 0x2b5   :  { %771 = vmax.xlane.f32.xlu1 %v1881_v8 }
 0x2b8   :  { %v690_v10 = vpop.f32.mrb[48].mxu0 }
 0x2b9   :  { %v1886_v11 = vadd.f32 %v1843_v45, %v690_v10  ;;  %v1304_v12 = vpop.f32.mrb[49].mxu0 }
 0x2ba   :  { %v693_v13 = vpop.f32.mrb[50].mxu0 }
 0x2bb   :  { %v1889_v14 = vadd.f32 %v1843_v45, %v693_v13  ;;  %773 = vmax.xlane.f32.xlu0 %v1886_v11  ;;  %v1305_v15 = vpop.f32.mrb[51].mxu0 }
 0x2bd   :  { %775 = vmax.xlane.f32.xlu1 %v1889_v14 }
 0x2c0   :  { %v698_v16 = vpop.f32.mrb[52].mxu0 }
 0x2c1   :  { %v1894_v18 = vadd.f32 %v1843_v45, %v698_v16  ;;  %v1308_v19 = vpop.f32.mrb[53].mxu0 }
 0x2c2   :  { %v701_v20 = vpop.f32.mrb[54].mxu0 }
 0x2c3   :  { %v1897_v21 = vadd.f32 %v1843_v45, %v701_v20  ;;  %777 = vmax.xlane.f32.xlu0 %v1894_v18  ;;  %v1309_v22 = vpop.f32.mrb[55].mxu0 }
 0x2c5   :  { %779 = vmax.xlane.f32.xlu1 %v1897_v21 }
 0x2c8   :  { %v706_v23 = vpop.f32.mrb[56].mxu0 }
 0x2c9   :  { %v1902_v24 = vadd.f32 %v1843_v45, %v706_v23  ;;  %v1312_v25 = vpop.f32.mrb[57].mxu0 }
 0x2ca   :  { %v709_v26 = vpop.f32.mrb[58].mxu0 }
 0x2cb   :  { %v1905_v27 = vadd.f32 %v1843_v45, %v709_v26  ;;  %781 = vmax.xlane.f32.xlu0 %v1902_v24  ;;  %v1313_v28 = vpop.f32.mrb[59].mxu0 }
 0x2cd   :  { %783 = vmax.xlane.f32.xlu1 %v1905_v27 }
 0x2d0   :  { %v714_v29 = vpop.f32.mrb[60].mxu0 }
 0x2d1   :  { %v1910_v30 = vadd.f32 %v1843_v45, %v714_v29  ;;  %v1316_v31 = vpop.f32.mrb[61].mxu0 }
 0x2d2   :  { %v717_v32 = vpop.f32.mrb[62].mxu0 }
 0x2d3   :  { %v1913_v33 = vadd.f32 %v1843_v45, %v717_v32  ;;  %785 = vmax.xlane.f32.xlu0 %v1910_v30  ;;  %v1317_v34 = vpop.f32.mrb[63].mxu0 }
 0x2d5   :  { %787 = vmax.xlane.f32.xlu1 %v1913_v33 }
 0x2d8   :  { %v722_v36 = vpop.f32.mrb[64].mxu0 }
 0x2d9   :  { %v1918_v37 = vadd.f32 %v1843_v45, %v722_v36  ;;  %v1320_v38 = vpop.f32.mrb[65].mxu0 }
 0x2da   :  { %v725_v39 = vpop.f32.mrb[66].mxu0 }
 0x2db   :  { %v1921_v40 = vadd.f32 %v1843_v45, %v725_v39  ;;  %789 = vmax.xlane.f32.xlu0 %v1918_v37  ;;  %v1321_v41 = vpop.f32.mrb[67].mxu0 }
 0x2dd   :  { %791 = vmax.xlane.f32.xlu1 %v1921_v40 }
 0x2e0   :  { %v730_v42 = vpop.f32.mrb[68].mxu0 }
 0x2e1   :  { %v1926_v43 = vadd.f32 %v1843_v45, %v730_v42  ;;  %v1324_v44 = vpop.f32.mrb[69].mxu0 }
 0x2e2   :  { %v733_v46 = vpop.f32.mrb[70].mxu0 }
 0x2e3   :  { %v1929_v48 = vadd.f32 %v1843_v45, %v733_v46  ;;  %793 = vmax.xlane.f32.xlu0 %v1926_v43  ;;  %v1325_v49 = vpop.f32.mrb[71].mxu0 }
 0x2e5   :  { %795 = vmax.xlane.f32.xlu1 %v1929_v48 }
 0x2e8   :  { %v738_v1 = vpop.f32.mrb[72].mxu0 }
 0x2e9   :  { %v1934_v50 = vadd.f32 %v1843_v45, %v738_v1  ;;  %v1328_v35 = vpop.f32.mrb[73].mxu0 }
 0x2ea   :  { %v741_v51 = vpop.f32.mrb[74].mxu0 }
 0x2eb   :  { %v1937_v52 = vadd.f32 %v1843_v45, %v741_v51  ;;  %797 = vmax.xlane.f32.xlu0 %v1934_v50  ;;  %v1329_v54 = vpop.f32.mrb[75].mxu0 }
 0x2ed   :  { %799 = vmax.xlane.f32.xlu1 %v1937_v52 }
 0x2f0   :  { %v746_v57 = vpop.f32.mrb[76].mxu0 }
 0x2f1   :  { %v1942_v58 = vadd.f32 %v1843_v45, %v746_v57  ;;  %v1332_v60 = vpop.f32.mrb[77].mxu0 }
 0x2f2   :  { %v749_v61 = vpop.f32.mrb[78].mxu0 }
 0x2f3   :  { %v1945_v63 = vadd.f32 %v1843_v45, %v749_v61  ;;  %801 = vmax.xlane.f32.xlu0 %v1942_v58  ;;  %v1333_v0 = vpop.f32.mrb[79].mxu0 }
 0x2f5   :  { %803 = vmax.xlane.f32.xlu1 %v1945_v63 }
 0x320   :  { %v754_v3 = vpop.xlane.xlu0 %753 }
 0x321   :  { %v1950_v4 = vsub.f32 %v1846_v47, %v754_v3 }
 0x323   :  { %v831_v6 = vmul.f32 1.442695, %v1950_v4 }
 0x324   :  { %v756_v7 = vpop.xlane.xlu0 %755 }
 0x325   :  { %1358 = vpow2.f32 %v831_v6  ;;  %v1954_v9 = vsub.f32 %v1850_v17, %v756_v7 }
 0x327   :  { %v833_v10 = vmul.f32 1.442695, %v1954_v9 }
 0x328   :  { %v758_v45 = vpop.xlane.xlu1 %757 }
 0x329   :  { %1360 = vpow2.f32 %v833_v10  ;;  %v1958_v12 = vsub.f32 %v1854_v55, %v758_v45 }
 0x32b   :  { %v835_v13 = vmul.f32 1.442695, %v1958_v12 }
 0x32c   :  { %v760_v15 = vpop.xlane.xlu1 %759 }
 0x32d   :  { %1362 = vpow2.f32 %v835_v13  ;;  %v1962_v47 = vsub.f32 %v1858_v53, %v760_v15 }
 0x32f   :  { %v1359_v16 = vpop.eup %1358  ;;  %v837_v19 = vmul.f32 1.442695, %v1962_v47 }
 0x330   :  { %v762_v20 = vpop.xlane.xlu0 %761  ;;  %883 = vadd.xlane.f32.xlu0 %v1359_v16 }
 0x331   :  { %1364 = vpow2.f32 %v837_v19  ;;  %v1966_v17 = vsub.f32 %v1862_v56, %v762_v20 }
 0x332   :  { %v764_v22 = vpop.xlane.xlu1 %763 }
 0x333   :  { %v1361_v23 = vpop.eup %1360  ;;  %v839_v55 = vmul.f32 1.442695, %v1966_v17  ;;  %v1970_v25 = vsub.f32 %v1865_v59, %v764_v22 }
 0x334   :  { %885 = vadd.xlane.f32.xlu1 %v1361_v23 }
 0x335   :  { %1366 = vpow2.f32 %v839_v55  ;;  %v841_v53 = vmul.f32 1.442695, %v1970_v25 }
 0x337   :  { %v1363_v26 = vpop.eup %1362  ;;  %1368 = vpow2.f32 %v841_v53 }
 0x338   :  { %v766_v28 = vpop.xlane.xlu0 %765  ;;  %887 = vadd.xlane.f32.xlu0 %v1363_v26 }
 0x339   :  { %v1974_v29 = vsub.f32 %v1870_v62, %v766_v28 }
 0x33a   :  { %v768_v56 = vpop.xlane.xlu1 %767 }
 0x33b   :  { %v1365_v31 = vpop.eup %1364  ;;  %v843_v32 = vmul.f32 1.442695, %v1974_v29  ;;  %v1978_v34 = vsub.f32 %v1873_v2, %v768_v56 }
 0x33c   :  { %889 = vadd.xlane.f32.xlu1 %v1365_v31 }
 0x33d   :  { %1370 = vpow2.f32 %v843_v32  ;;  %v845_v59 = vmul.f32 1.442695, %v1978_v34 }
 0x33f   :  { %v1367_v36 = vpop.eup %1366  ;;  %1372 = vpow2.f32 %v845_v59 }
 0x340   :  { %v770_v38 = vpop.xlane.xlu0 %769  ;;  %891 = vadd.xlane.f32.xlu0 %v1367_v36 }
 0x341   :  { %v1369_v39 = vpop.eup %1368  ;;  %v1982_v41 = vsub.f32 %v1878_v5, %v770_v38 }
 0x342   :  { %v772_v62 = vpop.xlane.xlu1 %771  ;;  %893 = vadd.xlane.f32.xlu1 %v1369_v39 }
 0x343   :  { %v847_v42 = vmul.f32 1.442695, %v1982_v41  ;;  %v1986_v44 = vsub.f32 %v1881_v8, %v772_v62 }
 0x345   :  { %1374 = vpow2.f32 %v847_v42  ;;  %v849_v2 = vmul.f32 1.442695, %v1986_v44 }
 0x347   :  { %v1371_v46 = vpop.eup %1370  ;;  %1376 = vpow2.f32 %v849_v2 }
 0x348   :  { %v774_v49 = vpop.xlane.xlu0 %773  ;;  %895 = vadd.xlane.f32.xlu0 %v1371_v46 }
 0x349   :  { %v1373_v1 = vpop.eup %1372  ;;  %v1990_v35 = vsub.f32 %v1886_v11, %v774_v49 }
 0x34a   :  { %v776_v5 = vpop.xlane.xlu1 %775  ;;  %897 = vadd.xlane.f32.xlu1 %v1373_v1 }
 0x34b   :  { %v851_v51 = vmul.f32 1.442695, %v1990_v35  ;;  %v1994_v54 = vsub.f32 %v1889_v14, %v776_v5 }
 0x34d   :  { %1378 = vpow2.f32 %v851_v51  ;;  %v853_v8 = vmul.f32 1.442695, %v1994_v54 }
 0x34f   :  { %v1375_v57 = vpop.eup %1374  ;;  %1380 = vpow2.f32 %v853_v8 }
 0x350   :  { %v778_v60 = vpop.xlane.xlu0 %777  ;;  %899 = vadd.xlane.f32.xlu0 %v1375_v57 }
 0x351   :  { %v1377_v61 = vpop.eup %1376  ;;  %v1998_v0 = vsub.f32 %v1894_v18, %v778_v60 }
 0x352   :  { %v780_v11 = vpop.xlane.xlu1 %779  ;;  %901 = vadd.xlane.f32.xlu1 %v1377_v61 }
 0x353   :  { %v855_v3 = vmul.f32 1.442695, %v1998_v0  ;;  %v2002_v6 = vsub.f32 %v1897_v21, %v780_v11 }
 0x355   :  { %1382 = vpow2.f32 %v855_v3  ;;  %v857_v14 = vmul.f32 1.442695, %v2002_v6 }
 0x357   :  { %v1379_v7 = vpop.eup %1378  ;;  %1384 = vpow2.f32 %v857_v14 }
 0x358   :  { %v782_v10 = vpop.xlane.xlu0 %781  ;;  %903 = vadd.xlane.f32.xlu0 %v1379_v7 }
 0x359   :  { %v1381_v45 = vpop.eup %1380  ;;  %v2006_v13 = vsub.f32 %v1902_v24, %v782_v10 }
 0x35a   :  { %v784_v18 = vpop.xlane.xlu1 %783  ;;  %905 = vadd.xlane.f32.xlu1 %v1381_v45 }
 0x35b   :  { %v859_v15 = vmul.f32 1.442695, %v2006_v13  ;;  %v2010_v16 = vsub.f32 %v1905_v27, %v784_v18 }
 0x35d   :  { %1386 = vpow2.f32 %v859_v15  ;;  %v861_v21 = vmul.f32 1.442695, %v2010_v16 }
 0x35f   :  { %v1383_v19 = vpop.eup %1382  ;;  %1388 = vpow2.f32 %v861_v21 }
 0x360   :  { %v786_v20 = vpop.xlane.xlu0 %785  ;;  %907 = vadd.xlane.f32.xlu0 %v1383_v19 }
 0x361   :  { %v1385_v22 = vpop.eup %1384  ;;  %v2014_v23 = vsub.f32 %v1910_v30, %v786_v20 }
 0x362   :  { %v788_v24 = vpop.xlane.xlu1 %787  ;;  %909 = vadd.xlane.f32.xlu1 %v1385_v22 }
 0x363   :  { %v863_v55 = vmul.f32 1.442695, %v2014_v23  ;;  %v2018_v53 = vsub.f32 %v1913_v33, %v788_v24 }
 0x365   :  { %1390 = vpow2.f32 %v863_v55  ;;  %v865_v27 = vmul.f32 1.442695, %v2018_v53 }
 0x367   :  { %v1387_v26 = vpop.eup %1386  ;;  %1392 = vpow2.f32 %v865_v27 }
 0x368   :  { %v790_v28 = vpop.xlane.xlu0 %789  ;;  %911 = vadd.xlane.f32.xlu0 %v1387_v26 }
 0x369   :  { %v1389_v56 = vpop.eup %1388  ;;  %v2022_v31 = vsub.f32 %v1918_v37, %v790_v28 }
 0x36a   :  { %v792_v30 = vpop.xlane.xlu1 %791  ;;  %913 = vadd.xlane.f32.xlu1 %v1389_v56 }
 0x36b   :  { %v867_v32 = vmul.f32 1.442695, %v2022_v31  ;;  %v2026_v59 = vsub.f32 %v1921_v40, %v792_v30 }
 0x36d   :  { %1394 = vpow2.f32 %v867_v32  ;;  %v869_v33 = vmul.f32 1.442695, %v2026_v59 }
 0x36f   :  { %v1391_v36 = vpop.eup %1390  ;;  %1396 = vpow2.f32 %v869_v33 }
 0x370   :  { %v794_v38 = vpop.xlane.xlu0 %793  ;;  %915 = vadd.xlane.f32.xlu0 %v1391_v36 }
 0x371   :  { %v1393_v39 = vpop.eup %1392  ;;  %v2030_v62 = vsub.f32 %v1926_v43, %v794_v38 }
 0x372   :  { %v796_v37 = vpop.xlane.xlu1 %795  ;;  %917 = vadd.xlane.f32.xlu1 %v1393_v39 }
 0x373   :  { %v871_v42 = vmul.f32 1.442695, %v2030_v62  ;;  %v2034_v2 = vsub.f32 %v1929_v48, %v796_v37 }
 0x375   :  { %1398 = vpow2.f32 %v871_v42  ;;  %v873_v40 = vmul.f32 1.442695, %v2034_v2 }
 0x377   :  { %v1395_v46 = vpop.eup %1394  ;;  %1400 = vpow2.f32 %v873_v40 }
 0x378   :  { %v798_v49 = vpop.xlane.xlu0 %797  ;;  %919 = vadd.xlane.f32.xlu0 %v1395_v46 }
 0x379   :  { %v1397_v1 = vpop.eup %1396  ;;  %v2038_v5 = vsub.f32 %v1934_v50, %v798_v49 }
 0x37a   :  { %v800_v43 = vpop.xlane.xlu1 %799  ;;  %921 = vadd.xlane.f32.xlu1 %v1397_v1 }
 0x37b   :  { %v875_v51 = vmul.f32 1.442695, %v2038_v5  ;;  %v2042_v8 = vsub.f32 %v1937_v52, %v800_v43 }
 0x37d   :  { %1402 = vpow2.f32 %v875_v51  ;;  %v877_v48 = vmul.f32 1.442695, %v2042_v8 }
 0x37f   :  { %v1399_v57 = vpop.eup %1398  ;;  %1404 = vpow2.f32 %v877_v48 }
 0x380   :  { %923 = vadd.xlane.f32.xlu0 %v1399_v57  ;;  %v802_v60 = vpop.xlane.xlu0 %801 }
 0x381   :  { %v1401_v61 = vpop.eup %1400  ;;  %v2046_v11 = vsub.f32 %v1942_v58, %v802_v60 }
 0x382   :  { %925 = vadd.xlane.f32.xlu1 %v1401_v61  ;;  %v804_v50 = vpop.xlane.xlu1 %803 }
 0x383   :  { %v879_v3 = vmul.f32 1.442695, %v2046_v11  ;;  %v2050_v14 = vsub.f32 %v1945_v63, %v804_v50 }
 0x385   :  { %1406 = vpow2.f32 %v879_v3  ;;  %v881_v52 = vmul.f32 1.442695, %v2050_v14 }
 0x387   :  { %v1403_v7 = vpop.eup %1402  ;;  %1408 = vpow2.f32 %v881_v52 }
 0x388   :  { %927 = vadd.xlane.f32.xlu0 %v1403_v7 }
 0x389   :  { %v1405_v10 = vpop.eup %1404 }
 0x38a   :  { %929 = vadd.xlane.f32.xlu1 %v1405_v10 }
 0x38f   :  { %v1407_v45 = vpop.eup %1406 }
 0x390   :  { %931 = vadd.xlane.f32.xlu0 %v1407_v45 }
 0x391   :  { %v1409_v18 = vpop.eup %1408 }
 0x392   :  { %933 = vadd.xlane.f32.xlu1 %v1409_v18 }
 0x3bd   :  { %v884_v58 = vpop.xlane.xlu0 %883 }
 0x3be   :  { %1410 = vlog2.f32 %v884_v58 }
 0x3c1   :  { %v886_v15 = vpop.xlane.xlu1 %885 }
 0x3c2   :  { %1412 = vlog2.f32 %v886_v15 }
 0x3c5   :  { %v888_v21 = vpop.xlane.xlu0 %887 }
 0x3c6   :  { %1414 = vlog2.f32 %v888_v21 }
 0x3c8   :  { %v1411_v63 = vpop.eup %1410 }
 0x3c9   :  { %v936_v19 = vmul.f32 0.6931472, %v1411_v63  ;;  %v890_v20 = vpop.xlane.xlu1 %889 }
 0x3ca   :  { %1416 = vlog2.f32 %v890_v20 }
 0x3cb   :  { %v987_v22 = vsub.f32 %v1950_v4, %v936_v19 }
 0x3cc   :  { %v1413_v24 = vpop.eup %1412 }
 0x3cd   :  { %1013 = vst [vmem:[#allocation2] sm:$0xff] %v987_v22  ;;  %v938_v55 = vmul.f32 0.6931472, %v1413_v24  ;;  %v892_v27 = vpop.xlane.xlu0 %891 }
 0x3ce   :  { %1418 = vlog2.f32 %v892_v27 }
 0x3cf   :  { %v988_v26 = vsub.f32 %v1954_v9, %v938_v55  ;;  %v894_v28 = vpop.xlane.xlu1 %893 }
 0x3d0   :  { %v1415_v56 = vpop.eup %1414  ;;  %1420 = vlog2.f32 %v894_v28 }
 0x3d1   :  { %1014 = vst [vmem:[#allocation2 + $0x8] sm:$0xff] %v988_v26  ;;  %v940_v30 = vmul.f32 0.6931472, %v1415_v56 }
 0x3d3   :  { %v989_v32 = vsub.f32 %v1958_v12, %v940_v30 }
 0x3d4   :  { %v1417_v33 = vpop.eup %1416 }
 0x3d5   :  { %1015 = vst [vmem:[#allocation2 + $0x10] sm:$0xff] %v989_v32  ;;  %v942_v36 = vmul.f32 0.6931472, %v1417_v33  ;;  %v896_v38 = vpop.xlane.xlu0 %895 }
 0x3d6   :  { %1422 = vlog2.f32 %v896_v38 }
 0x3d7   :  { %v990_v4 = vsub.f32 %v1962_v47, %v942_v36  ;;  %v898_v39 = vpop.xlane.xlu1 %897 }
 0x3d8   :  { %v1419_v37 = vpop.eup %1418  ;;  %1424 = vlog2.f32 %v898_v39 }
 0x3d9   :  { %1016 = vst [vmem:[#allocation2 + $0x18] sm:$0xff] %v990_v4  ;;  %v944_v42 = vmul.f32 0.6931472, %v1419_v37 }
 0x3da   :  { %v1421_v9 = vpop.eup %1420 }
 0x3db   :  { %v991_v40 = vsub.f32 %v1966_v17, %v944_v42  ;;  %v946_v46 = vmul.f32 0.6931472, %v1421_v9 }
 0x3dd   :  { %1017 = vst [vmem:[#allocation2 + $0x20] sm:$0xff] %v991_v40  ;;  %v992_v49 = vsub.f32 %v1970_v25, %v946_v46  ;;  %v900_v12 = vpop.xlane.xlu0 %899 }
 0x3de   :  { %1426 = vlog2.f32 %v900_v12 }
 0x3df   :  { %1018 = vst [vmem:[#allocation2 + $0x28] sm:$0xff] %v992_v49  ;;  %v902_v1 = vpop.xlane.xlu1 %901 }
 0x3e0   :  { %v1423_v43 = vpop.eup %1422  ;;  %1428 = vlog2.f32 %v902_v1 }
 0x3e1   :  { %v948_v51 = vmul.f32 0.6931472, %v1423_v43 }
 0x3e2   :  { %v1425_v47 = vpop.eup %1424 }
 0x3e3   :  { %v993_v48 = vsub.f32 %v1974_v29, %v948_v51  ;;  %v950_v57 = vmul.f32 0.6931472, %v1425_v47 }
 0x3e5   :  { %1019 = vst [vmem:[#allocation2 + $0x30] sm:$0xff] %v993_v48  ;;  %v994_v60 = vsub.f32 %v1978_v34, %v950_v57  ;;  %v904_v61 = vpop.xlane.xlu0 %903 }
 0x3e6   :  { %1430 = vlog2.f32 %v904_v61 }
 0x3e7   :  { %1020 = vst [vmem:[#allocation2 + $0x38] sm:$0xff] %v994_v60  ;;  %v906_v17 = vpop.xlane.xlu1 %905 }
 0x3e8   :  { %v1427_v50 = vpop.eup %1426  ;;  %1432 = vlog2.f32 %v906_v17 }
 0x3e9   :  { %v952_v25 = vmul.f32 0.6931472, %v1427_v50 }
 0x3ea   :  { %v1429_v3 = vpop.eup %1428 }
 0x3eb   :  { %v995_v52 = vsub.f32 %v1982_v41, %v952_v25  ;;  %v954_v7 = vmul.f32 0.6931472, %v1429_v3 }
 0x3ed   :  { %1021 = vst [vmem:[#allocation2 + $0x40] sm:$0xff] %v995_v52  ;;  %v996_v10 = vsub.f32 %v1986_v44, %v954_v7  ;;  %v908_v45 = vpop.xlane.xlu0 %907 }
 0x3ee   :  { %1434 = vlog2.f32 %v908_v45 }
 0x3ef   :  { %1022 = vst [vmem:[#allocation2 + $0x48] sm:$0xff] %v996_v10  ;;  %v910_v29 = vpop.xlane.xlu1 %909 }
 0x3f0   :  { %v1431_v18 = vpop.eup %1430  ;;  %1436 = vlog2.f32 %v910_v29 }
 0x3f1   :  { %v956_v34 = vmul.f32 0.6931472, %v1431_v18 }
 0x3f2   :  { %v1433_v58 = vpop.eup %1432 }
 0x3f3   :  { %v997_v15 = vsub.f32 %v1990_v35, %v956_v34  ;;  %v958_v21 = vmul.f32 0.6931472, %v1433_v58 }
 0x3f5   :  { %1023 = vst [vmem:[#allocation2 + $0x50] sm:$0xff] %v997_v15  ;;  %v998_v63 = vsub.f32 %v1994_v54, %v958_v21  ;;  %v912_v19 = vpop.xlane.xlu0 %911 }
 0x3f6   :  { %1438 = vlog2.f32 %v912_v19 }
 0x3f7   :  { %1024 = vst [vmem:[#allocation2 + $0x58] sm:$0xff] %v998_v63  ;;  %v914_v41 = vpop.xlane.xlu1 %913 }
 0x3f8   :  { %v1435_v20 = vpop.eup %1434  ;;  %1440 = vlog2.f32 %v914_v41 }
 0x3f9   :  { %v960_v44 = vmul.f32 0.6931472, %v1435_v20 }
 0x3fa   :  { %v1437_v22 = vpop.eup %1436 }
 0x3fb   :  { %v999_v24 = vsub.f32 %v1998_v0, %v960_v44  ;;  %v962_v55 = vmul.f32 0.6931472, %v1437_v22 }
 0x3fd   :  { %1025 = vst [vmem:[#allocation2 + $0x60] sm:$0xff] %v999_v24  ;;  %v1000_v27 = vsub.f32 %v2002_v6, %v962_v55  ;;  %v916_v26 = vpop.xlane.xlu0 %915 }
 0x3fe   :  { %1442 = vlog2.f32 %v916_v26 }
 0x3ff   :  { %1026 = vst [vmem:[#allocation2 + $0x68] sm:$0xff] %v1000_v27  ;;  %v918_v35 = vpop.xlane.xlu1 %917 }
 0x400   :  { %v1439_v28 = vpop.eup %1438  ;;  %1444 = vlog2.f32 %v918_v35 }
 0x401   :  { %v964_v54 = vmul.f32 0.6931472, %v1439_v28 }
 0x402   :  { %v1441_v56 = vpop.eup %1440 }
 0x403   :  { %v1001_v30 = vsub.f32 %v2006_v13, %v964_v54  ;;  %v966_v32 = vmul.f32 0.6931472, %v1441_v56 }
 0x405   :  { %1027 = vst [vmem:[#allocation2 + $0x70] sm:$0xff] %v1001_v30  ;;  %v1002_v33 = vsub.f32 %v2010_v16, %v966_v32  ;;  %v920_v36 = vpop.xlane.xlu0 %919 }
 0x406   :  { %1446 = vlog2.f32 %v920_v36 }
 0x407   :  { %1028 = vst [vmem:[#allocation2 + $0x78] sm:$0xff] %v1002_v33  ;;  %v922_v0 = vpop.xlane.xlu1 %921 }
 0x408   :  { %v1443_v38 = vpop.eup %1442  ;;  %1448 = vlog2.f32 %v922_v0 }
 0x409   :  { %v968_v6 = vmul.f32 0.6931472, %v1443_v38 }
 0x40a   :  { %v1445_v4 = vpop.eup %1444 }
 0x40b   :  { %v1003_v39 = vsub.f32 %v2014_v23, %v968_v6  ;;  %v970_v37 = vmul.f32 0.6931472, %v1445_v4 }
 0x40d   :  { %1029 = vst [vmem:[#allocation2 + $0x80] sm:$0xff] %v1003_v39  ;;  %v1004_v42 = vsub.f32 %v2018_v53, %v970_v37  ;;  %v924_v9 = vpop.xlane.xlu0 %923 }
 0x40e   :  { %1450 = vlog2.f32 %v924_v9 }
 0x40f   :  { %1030 = vst [vmem:[#allocation2 + $0x88] sm:$0xff] %v1004_v42  ;;  %v926_v13 = vpop.xlane.xlu1 %925 }
 0x410   :  { %v1447_v40 = vpop.eup %1446  ;;  %1452 = vlog2.f32 %v926_v13 }
 0x411   :  { %v972_v16 = vmul.f32 0.6931472, %v1447_v40 }
 0x412   :  { %v1449_v46 = vpop.eup %1448 }
 0x413   :  { %v1005_v49 = vsub.f32 %v2022_v31, %v972_v16  ;;  %v974_v12 = vmul.f32 0.6931472, %v1449_v46 }
 0x415   :  { %1031 = vst [vmem:[#allocation2 + $0x90] sm:$0xff] %v1005_v49  ;;  %v1006_v1 = vsub.f32 %v2026_v59, %v974_v12  ;;  %v928_v43 = vpop.xlane.xlu0 %927 }
 0x416   :  { %1454 = vlog2.f32 %v928_v43 }
 0x417   :  { %1032 = vst [vmem:[#allocation2 + $0x98] sm:$0xff] %v1006_v1  ;;  %v930_v23 = vpop.xlane.xlu1 %929 }
 0x418   :  { %v1451_v51 = vpop.eup %1450  ;;  %1456 = vlog2.f32 %v930_v23 }
 0x419   :  { %v976_v53 = vmul.f32 0.6931472, %v1451_v51 }
 0x41a   :  { %v1453_v47 = vpop.eup %1452 }
 0x41b   :  { %v1007_v48 = vsub.f32 %v2030_v62, %v976_v53  ;;  %v978_v57 = vmul.f32 0.6931472, %v1453_v47 }
 0x41d   :  { %1033 = vst [vmem:[#allocation2 + $0xa0] sm:$0xff] %v1007_v48  ;;  %v1008_v60 = vsub.f32 %v2034_v2, %v978_v57  ;;  %v932_v61 = vpop.xlane.xlu0 %931 }
 0x41e   :  { %1458 = vlog2.f32 %v932_v61 }
 0x41f   :  { %1034 = vst [vmem:[#allocation2 + $0xa8] sm:$0xff] %v1008_v60  ;;  %v934_v31 = vpop.xlane.xlu1 %933 }
 0x420   :  { %v1455_v17 = vpop.eup %1454  ;;  %1460 = vlog2.f32 %v934_v31 }
 0x421   :  { %v980_v59 = vmul.f32 0.6931472, %v1455_v17 }
 0x422   :  { %v1457_v50 = vpop.eup %1456 }
 0x423   :  { %v1009_v25 = vsub.f32 %v2038_v5, %v980_v59  ;;  %v982_v3 = vmul.f32 0.6931472, %v1457_v50 }
 0x425   :  { %1035 = vst [vmem:[#allocation2 + $0xb0] sm:$0xff] %v1009_v25  ;;  %v1010_v52 = vsub.f32 %v2042_v8, %v982_v3 }
 0x427   :  { %1036 = vst [vmem:[#allocation2 + $0xb8] sm:$0xff] %v1010_v52 }
 0x428   :  { %v1459_v62 = vpop.eup %1458 }
 0x429   :  { %v984_v7 = vmul.f32 0.6931472, %v1459_v62 }
 0x42a   :  { %v1461_v10 = vpop.eup %1460 }
 0x42b   :  { %v1011_v2 = vsub.f32 %v2046_v11, %v984_v7  ;;  %v986_v45 = vmul.f32 0.6931472, %v1461_v10 }
 0x42d   :  { %1037 = vst [vmem:[#allocation2 + $0xc0] sm:$0xff] %v1011_v2  ;;  %v1012_v29 = vsub.f32 %v2050_v14, %v986_v45 }
 0x42f   :  { %1038 = vst [vmem:[#allocation2 + $0xc8] sm:$0xff] %v1012_v29 }
 0x430   :  { %1043 = vsyncadd [#allocation3], 128  ;;  %s1488_s6 = smov [#allocation2]  }
 0x431   :  { %s1044_s15 = sshll.u32 %s1488_s6, 4  ;;  %s1045_s15 = int_to_ptr.vmem [resolvable:$true] %s1044_s15 }
 0x432   :  { %s1462_s16 = scalar_lea.vmem %s1045_s15, 3200  ;;  %s1466_s17 = scalar_lea.vmem %s1045_s15, 3328 }
 0x433   :  { %p1463_p0 = scmp.ne.s32.totalorder %s1045_s15, %s1462_s16  ;;  %p1467_p1 = scmp.lt.s32.totalorder %s1045_s15, %s1045_s15 }
 0x434   :  { %p1468_p2 = scmp.lt.s32.totalorder %s1466_s17, %s1462_s16 }
 0x436   :  { %p1469_p3 = por %p1468_p2, %p1467_p1 }
 0x438   :  { %p1470_p4 = pnand %p1469_p3, %p1463_p0 }
 0x43a   :  { %1473 = shalt.err (!%p1470_p4)
}
 0x43b   :  { %s1474_s20 = scalar_lea.hbm %s2098_s7, 3200 }
 0x43c   :  { %p1475_p5 = scmp.ne.s32.totalorder %s2098_s7, %s1474_s20  ;;  %p1478_p6 = scmp.lt.u32.totalorder %s1474_s20, %s2098_s7 }
 0x43e   :  { %p1480_p7 = pnand %p1478_p6, %p1475_p5 }
 0x440   :  { %1483 = shalt.err (!%p1480_p7)
}
 0x441   :  { %s1489_s24 = smov 128   ;;  %s1490_s25 = smov 8  }
 0x442   :  { %1050 = dma.vmem_to_hbm [thread:$0]  %s1045_s15, 3200, %s2098_s7, [#allocation3], %s1489_s24, %s1489_s24, %s1490_s25  }
 0x443   :  { %1484 = dma.done.wait [#allocation3], 3328  }
 0x444   :  { %1485 = vsyncadd [#allocation3], 4294963968 }
 0x445   :  { %1054 = vsyncpa [#allocation3], 1 }

</bundles_post_ra>
